<compile_context>
chip_gen: v7x
topology: tpu7x:2x2x1
jax: 0.10.0
libtpu: 0.0.40
codegen_flags: <defaults>
</compile_context>

<pallas_src>
import functools

import jax
import jax.numpy as jnp
from jax.experimental import pallas as pl
from jax.experimental.pallas import tpu as pltpu

# ---- module hyper-parameters (mirror GraphAttentionLayer.__init__) -----------
ALPHA = 0.2            # LeakyReLU negative slope
DROPOUT = 0.6          # F.dropout(training=self.training); eval -> no-op here
CONCAT = True          # apply ELU at the end
NEG_INF = -9000000000000000.0


def _gat_kernel(a1_ref, wh_ref, s2_ref, adj_ref, out_ref,
                *, tile_r, alpha, concat):
    # Per-graph resident inputs: Wh (bf16) and the lane-major logit row s2.
    r = pl.program_id(1)
    row0 = pl.multiple_of(r * tile_r, tile_r)

    wh = wh_ref.at[0]                                   # (N, F_out) bf16 ref view
    wh_tile = wh[pl.ds(row0, tile_r), :]                # (tile_r, F_out) bf16

    # s1[i] = Wh[i,:] . a1 -- VPU multiply + XLU lane reduce, f32 accumulation.
    a1 = a1_ref[...]                                    # (1, F_out) f32
    s1 = jnp.sum(wh_tile.astype(jnp.float32) * a1, axis=-1, keepdims=True)

    e = s1 + s2_ref[0]                                  # (tile_r, N) outer sum
    e = jnp.where(e > 0, e, alpha * e)                  # LeakyReLU(alpha)

    adj = adj_ref[0]                                    # (tile_r, N) bf16
    logits = jnp.where(adj > 0, e, NEG_INF)
    m = jnp.max(logits, axis=-1, keepdims=True)
    p = jnp.exp(logits - m)
    inv = pl.reciprocal(jnp.sum(p, axis=-1, keepdims=True), approx=True)

    # Keep the adj multiply: the reference module computes
    # h_prime = (adj.float() * softmax(...)) @ Wh.  The 1/denominator is a
    # per-row scalar, so it is applied after the matmul (tile_r x F_out work
    # instead of tile_r x N).
    att = (adj.astype(jnp.float32) * p).astype(jnp.bfloat16)

    # TODO(synk): training-mode F.dropout on the attention matrix is skipped
    # (eval semantics); add via pltpu.prng_seed + pltpu.stateful_bernoulli.

    h_prime = jnp.dot(att, wh[...], preferred_element_type=jnp.float32)
    h_prime = h_prime * inv

    if concat:
        # ELU.  exp(x)-1 instead of expm1: absolute error near 0 is ~1 ulp of
        # 1.0, far below the bf16 matmul noise; exp lowers on all TPU gens.
        out_ref[0] = jnp.where(h_prime > 0, h_prime, jnp.exp(h_prime) - 1.0)
    else:
        out_ref[0] = h_prime


def _pick_tile_r(n):
    for t in (512, 256, 128, 64, 32, 16, 8):
        if t <= n and n % t == 0:
            return t
    return n


def gat_forward(h, adj, W, a, *, tile_r=None, alpha=ALPHA, concat=CONCAT):
    """h: (B, N, F_in), adj: (B, N, N), W: (F_in, F_out), a: (2*F_out, 1)."""
    B, N, F_in = h.shape
    F_out = W.shape[1]
    assert W.shape == (F_in, F_out)
    assert a.shape == (2 * F_out, 1)
    if tile_r is None:
        tile_r = _pick_tile_r(N)
    assert N % tile_r == 0 and (tile_r % 8 == 0 or tile_r == N)

    # ---- hoisted per-graph precompute (plain XLA, f32) -----------------------
    Wh = jnp.einsum("bnf,fo->bno", h.astype(jnp.float32), W,
                    preferred_element_type=jnp.float32)         # (B, N, F_out)
    s2 = jnp.einsum("bno,o->bn", Wh, a[F_out:, 0]).reshape(B, 1, N)  # lane-major
    wh_bf16 = Wh.astype(jnp.bfloat16)                            # MXU RHS + s1 source
    a1 = a[:F_out, 0].reshape(1, F_out).astype(jnp.float32)

    # adj streamed as bf16: halves the dominant HBM traffic.  (Callers with
    # large graphs should store adj in bf16/int8 up front.)
    adj_bf16 = adj.astype(jnp.bfloat16)

    # ---- explicit scoped-VMEM budget -----------------------------------------
    need = (2 * tile_r * N * 2            # adj tile, double-buffered, bf16
            + 2 * N * F_out * 2           # resident Wh (bf16), double-buffered
            + 2 * 1 * N * 4               # s2 row
            + 2 * tile_r * F_out * 4      # output tile
            + 2 * 1 * F_out * 4)          # a1
    vmem_limit = min(64 << 20, max(32 << 20, 2 * need))

    kernel = functools.partial(_gat_kernel, tile_r=tile_r, alpha=alpha,
                               concat=concat)
    grid = (B, N // tile_r)

    return pl.pallas_call(
        kernel,
        out_shape=jax.ShapeDtypeStruct((B, N, F_out), jnp.float32),
        grid_spec=pltpu.PrefetchScalarGridSpec(
            num_scalar_prefetch=0,
            grid=grid,
            in_specs=[
                pl.BlockSpec((1, F_out), lambda b, r: (0, 0)),         # a1 (resident)
                pl.BlockSpec((1, N, F_out), lambda b, r: (b, 0, 0)),   # Wh (per graph)
                pl.BlockSpec((1, 1, N), lambda b, r: (b, 0, 0)),       # s2 (per graph)
                pl.BlockSpec((1, tile_r, N), lambda b, r: (b, r, 0)),  # adj row tile
            ],
            out_specs=pl.BlockSpec((1, tile_r, F_out), lambda b, r: (b, r, 0)),
        ),
        compiler_params=pltpu.CompilerParams(
            # No cross-tile carried state -> both axes parallel (uses both
            # TensorCores on v7x even for B=1).
            dimension_semantics=("parallel", "parallel"),
            vmem_limit_bytes=vmem_limit,
        ),
    )(a1, wh_bf16, s2, adj_bf16)


def xavier_uniform(key, shape, gain):
    fan_in, fan_out = shape[0], shape[1]
    bound = gain * jnp.sqrt(6.0 / (fan_in + fan_out))
    return jax.random.uniform(key, shape, jnp.float32, -bound, bound)


if __name__ == "__main__":
    key = jax.random.PRNGKey(0)
    k_w, k_a, k_h, k_adj = jax.random.split(key, 4)

    # Small but TPU-friendly shapes: batch of graphs, lane-dense F_out,
    # two row tiles per graph to exercise the tiling.
    B, N = 2, 256
    F_IN, F_OUT = 32, 128
    TILE_R = 128

    # Deterministic parameter init (matches nn.init.xavier_uniform_(gain=1.414)).
    W = xavier_uniform(k_w, (F_IN, F_OUT), 1.414)
    a = xavier_uniform(k_a, (2 * F_OUT, 1), 1.414)

    # Inputs: batched node features + binary adjacency with self-loops.
    h = jax.random.normal(k_h, (B, N, F_IN), jnp.float32)
    adj = (jax.random.uniform(k_adj, (B, N, N)) > 0.9).astype(jnp.float32)
    adj = jnp.maximum(adj, jnp.eye(N, dtype=jnp.float32)[None])

    out = gat_forward(h, adj, W, a, tile_r=TILE_R)
    jax.block_until_ready(out)

    # Pure-JAX f32 reference (matches the PyTorch forward, eval mode).
    def ref_one(hb, adjb):
        Wh = hb @ W
        e = Wh @ a[:F_OUT] + (Wh @ a[F_OUT:]).T
        e = jnp.where(e > 0, e, ALPHA * e)
        att = jnp.where(adjb > 0, e, NEG_INF)
        att = jax.nn.softmax(att, axis=1)
        h_prime = (adjb * att) @ Wh
        return jax.nn.elu(h_prime)

    ref = jax.vmap(ref_one)(h, adj)

    err = jnp.max(jnp.abs(out - ref))
    # Tolerance loosened for bf16 MXU/adj operands + approx reciprocal.
    assert jnp.allclose(out, ref, atol=3e-2, rtol=3e-2), \
        f"mismatch vs reference (max abs err {err})"

    print("KERNEL_OK")
</pallas_src>

<mosaic_0001>
module attributes {stable_mosaic.version = 11 : i64} {
  func.func @_gat_kernel(%arg0: i32, %arg1: i32, %arg2: memref<1x128xf32, #tpu.memory_space<vmem>>, %arg3: memref<1x256x128xbf16, #tpu.memory_space<vmem>>, %arg4: memref<1x1x256xf32, #tpu.memory_space<vmem>>, %arg5: memref<1x128x256xbf16, #tpu.memory_space<vmem>>, %arg6: memref<1x128x128xf32, #tpu.memory_space<vmem>>) attributes {dimension_semantics = [#tpu.dimension_semantics<parallel>, #tpu.dimension_semantics<parallel>], iteration_bounds = array<i64: 2, 2>, scalar_prefetch = 0 : i64, scratch_operands = 0 : i64, tpu.core_type = #tpu.core_type<tc>, window_params = [{pipeline_mode = #tpu.pipeline_mode<synchronous>, transform_indices = @transform_0, window_bounds = array<i64: 1, 128>}, {transform_indices = @transform_1, window_bounds = array<i64: 1, 256, 128>}, {transform_indices = @transform_2, window_bounds = array<i64: 1, 1, 256>}, {transform_indices = @transform_3, window_bounds = array<i64: 1, 128, 256>}, {transform_indices = @transform_4, window_bounds = array<i64: 1, 128, 128>}]} {
    %c128_i32 = arith.constant 128 : i32
    %0 = arith.muli %arg1, %c128_i32 : i32
    %1 = tpu.assume_multiple %0, 128 : i32
    %c0_i32 = arith.constant 0 : i32
    %c0_i32_0 = arith.constant 0 : i32
    %c0_i32_1 = arith.constant 0 : i32
    %2 = tpu.memref_slice %arg3[%c0_i32, %c0_i32_0, %c0_i32_1] : memref<1x256x128xbf16, #tpu.memory_space<vmem>> -> memref<1x256x128xbf16, #tpu.memory_space<vmem>>
    %3 = tpu.memref_squeeze %2 : memref<1x256x128xbf16, #tpu.memory_space<vmem>> -> memref<256x128xbf16, #tpu.memory_space<vmem>>
    %4 = arith.index_cast %1 : i32 to index
    %c0 = arith.constant 0 : index
    %5 = vector.load %3[%4, %c0] : memref<256x128xbf16, #tpu.memory_space<vmem>>, vector<128x128xbf16>
    %c0_2 = arith.constant 0 : index
    %c0_3 = arith.constant 0 : index
    %6 = vector.load %arg2[%c0_2, %c0_3] : memref<1x128xf32, #tpu.memory_space<vmem>>, vector<1x128xf32>
    %7 = arith.extf %5 : vector<128x128xbf16> to vector<128x128xf32>
    %8 = vector.broadcast %6 : vector<1x128xf32> to vector<128x128xf32>
    %9 = arith.mulf %7, %8 : vector<128x128xf32>
    %cst = arith.constant dense<0.000000e+00> : vector<128xf32>
    %10 = vector.multi_reduction <add>, %9, %cst [1] : vector<128x128xf32> to vector<128xf32>
    %11 = vector.shape_cast %10 : vector<128xf32> to vector<128x1xf32>
    %c0_4 = arith.constant 0 : index
    %c0_5 = arith.constant 0 : index
    %c0_6 = arith.constant 0 : index
    %12 = vector.load %arg4[%c0_4, %c0_5, %c0_6] : memref<1x1x256xf32, #tpu.memory_space<vmem>>, vector<1x1x256xf32>
    %13 = vector.shape_cast %12 : vector<1x1x256xf32> to vector<1x256xf32>
    %14 = vector.broadcast %11 : vector<128x1xf32> to vector<128x256xf32>
    %15 = vector.broadcast %13 : vector<1x256xf32> to vector<128x256xf32>
    %16 = arith.addf %14, %15 : vector<128x256xf32>
    %cst_7 = arith.constant 0.000000e+00 : f32
    %17 = vector.broadcast %cst_7 : f32 to vector<128x256xf32>
    %18 = arith.cmpf ogt, %16, %17 : vector<128x256xf32>
    %cst_8 = arith.constant 2.000000e-01 : f32
    %19 = vector.broadcast %cst_8 : f32 to vector<128x256xf32>
    %20 = arith.mulf %19, %16 : vector<128x256xf32>
    %21 = arith.select %18, %16, %20 : vector<128x256xi1>, vector<128x256xf32>
    %c0_9 = arith.constant 0 : index
    %c0_10 = arith.constant 0 : index
    %c0_11 = arith.constant 0 : index
    %22 = vector.load %arg5[%c0_9, %c0_10, %c0_11] : memref<1x128x256xbf16, #tpu.memory_space<vmem>>, vector<1x128x256xbf16>
    %23 = vector.shape_cast %22 : vector<1x128x256xbf16> to vector<128x256xbf16>
    %cst_12 = arith.constant 0.000000e+00 : bf16
    %24 = vector.broadcast %cst_12 : bf16 to vector<128x256xbf16>
    %25 = arith.cmpf ogt, %23, %24 : vector<128x256xbf16>
    %cst_13 = arith.constant -9.000000e+15 : f32
    %26 = vector.broadcast %cst_13 : f32 to vector<128x256xf32>
    %27 = arith.select %25, %21, %26 : vector<128x256xi1>, vector<128x256xf32>
    %cst_14 = arith.constant dense<0xFF800000> : vector<128xf32>
    %28 = vector.multi_reduction <maximumf>, %27, %cst_14 [1] : vector<128x256xf32> to vector<128xf32>
    %29 = vector.shape_cast %28 : vector<128xf32> to vector<128x1xf32>
    %30 = vector.broadcast %29 : vector<128x1xf32> to vector<128x256xf32>
    %31 = arith.subf %27, %30 : vector<128x256xf32>
    %32 = math.exp %31 : vector<128x256xf32>
    %cst_15 = arith.constant dense<0.000000e+00> : vector<128xf32>
    %33 = vector.multi_reduction <add>, %32, %cst_15 [1] : vector<128x256xf32> to vector<128xf32>
    %34 = vector.shape_cast %33 : vector<128xf32> to vector<128x1xf32>
    %35 = tpu.reciprocal %34 {approx = true} : vector<128x1xf32> -> vector<128x1xf32>
    %36 = arith.extf %23 : vector<128x256xbf16> to vector<128x256xf32>
    %37 = arith.mulf %36, %32 : vector<128x256xf32>
    %38 = arith.truncf %37 : vector<128x256xf32> to vector<128x256xbf16>
    %c0_16 = arith.constant 0 : index
    %c0_17 = arith.constant 0 : index
    %c0_18 = arith.constant 0 : index
    %39 = vector.load %arg3[%c0_16, %c0_17, %c0_18] : memref<1x256x128xbf16, #tpu.memory_space<vmem>>, vector<1x256x128xbf16>
    %40 = vector.shape_cast %39 : vector<1x256x128xbf16> to vector<256x128xbf16>
    %cst_19 = arith.constant dense<0.000000e+00> : vector<128x128xf32>
    %41 = tpu.matmul %38, %40, %cst_19 {dimension_numbers = #tpu.dot_dimension_numbers<[1], [0], [0], [1], [0, 0, 1, 1], [], []>} : vector<128x256xbf16>, vector<256x128xbf16>, vector<128x128xf32> -> vector<128x128xf32>
    %42 = vector.broadcast %35 : vector<128x1xf32> to vector<128x128xf32>
    %43 = arith.mulf %41, %42 : vector<128x128xf32>
    %cst_20 = arith.constant 0.000000e+00 : f32
    %44 = vector.broadcast %cst_20 : f32 to vector<128x128xf32>
    %45 = arith.cmpf ogt, %43, %44 : vector<128x128xf32>
    %46 = math.exp %43 : vector<128x128xf32>
    %cst_21 = arith.constant 1.000000e+00 : f32
    %47 = vector.broadcast %cst_21 : f32 to vector<128x128xf32>
    %48 = arith.subf %46, %47 : vector<128x128xf32>
    %49 = arith.select %45, %43, %48 : vector<128x128xi1>, vector<128x128xf32>
    %c0_22 = arith.constant 0 : index
    %c0_23 = arith.constant 0 : index
    %c0_24 = arith.constant 0 : index
    %50 = vector.load %arg6[%c0_22, %c0_23, %c0_24] : memref<1x128x128xf32, #tpu.memory_space<vmem>>, vector<1x128x128xf32>
    %51 = vector.shape_cast %50 : vector<1x128x128xf32> to vector<128x128xf32>
    %52 = vector.shape_cast %49 : vector<128x128xf32> to vector<1x128x128xf32>
    tpu.vector_store %arg6[%c0_22, %c0_23, %c0_24], %52 {strides = array<i32>} : memref<1x128x128xf32, #tpu.memory_space<vmem>>, vector<1x128x128xf32>,
    return
  }
  func.func @transform_0(%arg0: i32, %arg1: i32) -> (i32, i32) {
    %c0_i32 = arith.constant 0 : i32
    %c0_i32_0 = arith.constant 0 : i32
    %c0_i32_1 = arith.constant 0 : i32
    return %c0_i32, %c0_i32_0 : i32, i32
  }
  func.func @transform_1(%arg0: i32, %arg1: i32) -> (i32, i32, i32) {
    %c0_i32 = arith.constant 0 : i32
    %c0_i32_0 = arith.constant 0 : i32
    %c0_i32_1 = arith.constant 0 : i32
    return %arg0, %c0_i32, %c0_i32_0 : i32, i32, i32
  }
  func.func @transform_2(%arg0: i32, %arg1: i32) -> (i32, i32, i32) {
    %c0_i32 = arith.constant 0 : i32
    %c0_i32_0 = arith.constant 0 : i32
    %c0_i32_1 = arith.constant 0 : i32
    return %arg0, %c0_i32, %c0_i32_0 : i32, i32, i32
  }
  func.func @transform_3(%arg0: i32, %arg1: i32) -> (i32, i32, i32) {
    %c0_i32 = arith.constant 0 : i32
    %c0_i32_0 = arith.constant 0 : i32
    return %arg0, %arg1, %c0_i32 : i32, i32, i32
  }
  func.func @transform_4(%arg0: i32, %arg1: i32) -> (i32, i32, i32) {
    %c0_i32 = arith.constant 0 : i32
    %c0_i32_0 = arith.constant 0 : i32
    return %arg0, %arg1, %c0_i32 : i32, i32, i32
  }
}

</mosaic_0001>

<bundles_post_ra>
// kernel: tpu_custom_call.1
= control target key start
LH: loop header
LB: loop body
LE: loop exit
PB: predicated region body
PF: predicated region fallthrough
CT: control target
= control target key end

     0   :  { %s3398_s0 = inlined_call_operand.hbm [shape: f32[1,128], index: 0, kind: input, shape index: {}]   ;;  %s3399_s1 = inlined_call_operand.hbm [shape: bf16[2,256,128], index: 1, kind: input, shape index: {}]   ;;  %s3400_s2 = inlined_call_operand.vmem [shape: f32[2,1,256], index: 2, kind: input, shape index: {}]   ;;  %s3401_s3 = inlined_call_operand.hbm [shape: bf16[2,256,256], index: 3, kind: input, shape index: {}]   ;;  %s3402_s4 = inlined_call_operand.hbm [shape: f32[2,256,128], index: 4, kind: output, shape index: {}]  }
   0x1   :  { %3440 = sst [smem:[#allocation32_spill]] %s3398_s0 }
   0x2   :  { %3441 = sst [smem:[#allocation33_spill]] %s3399_s1 }
   0x3   :  { %3442 = sst [smem:[#allocation34_spill]] %s3402_s4 }
   0x4   :  { %9 = vsyncpa [#allocation3], 0 }
   0x5   :  { %10 = vsyncpa [#allocation6], 0 }
   0x6   :  { %12 = vsyncpa [#allocation6 + $0x1], 0 }
   0x7   :  { %13 = vsyncpa [#allocation4], 0 }
   0x8   :  { %15 = vsyncpa [#allocation4 + $0x1], 0  ;;  %s2171_s15 = smov 0   ;;  %s2173_s16 = smov 0  }
   0x9   :  { %s2175_s17 = smov 0   ;;  %s2177_s18 = smov 0  }
   0xa   :  { %s2179_s19 = smov 0   ;;  %s2181_s20 = smov 0  }
   0xb   :  { %s2183_s21 = smov 0   ;;  %s2185_s22 = smov 0  }
   0xc   :  { %s2187_s23 = smov 0   ;;  %s2189_s24 = smov 0  }
   0xd   :  { %s2191_s25 = smov 0  }
   0xe LB: > { %3443 = sst [smem:[#allocation13_spill]] %s2093_s15  ;;  %p68_p0 = scmp.ne.s32.totalorder %s2113_s20, %s2109_s19  ;;  %s2133_s25 = sphi %s2191_s25, %s21_s25   ;;  %s2129_s24 = sphi %s2189_s24, %s3600_s24   ;;  %s2125_s23 = sphi %s2187_s23, %s3599_s23   ;;  %s2121_s22 = sphi %s2185_s22, %s3598_s22   ;;  %s2117_s21 = sphi %s2183_s21, %s3597_s21   ;;  %s2113_s20 = sphi %s2181_s20, %s3596_s20   ;;  %s2109_s19 = sphi %s2179_s19, %s3595_s19   ;;  %s2105_s18 = sphi %s2177_s18, %s3594_s18   ;;  %s2101_s17 = sphi %s2175_s17, %s3593_s17   ;;  %s2097_s16 = sphi %s2173_s16, %s3592_s16   ;;  %s2093_s15 = sphi %s2171_s15, %s3591_s15  }
   0xf   : > { %3444 = sst [smem:[#allocation14_spill]] %s2133_s25  ;;  %p69_p1 = scmp.eq.s32.totalorder %s2133_s25, 0 }
  0x10   : > { %p3403_p2 = scmp.lt.s32.totalorder %s2133_s25, 4  ;;  %s191_s28 = sand.u32 1, %s2133_s25  }
  0x11   : > { %p70_p3 = por %p69_p1, %p68_p0  ;;  %s193_s29 = sand.u32 1, %s2113_s20  }
  0x12   : > { %s1465_s30 = sshll.u32 %s193_s29, 7  ;;  %s1520_s5 = sshll.u32 %s2129_s24, 11 }
  0x13   : > { %s3445_s1 = sld [smem:[#allocation33_spill]]  ;;  %s195_s9 = scalar_lea.vmem [#allocation5], %s1465_s30 }
  0x14   : > { %s202_s10 = sshll.u32 %s195_s9, 4  ;;  %p2244_p4 = pnand %p3403_p2, %p70_p3  ;;  %s2248_s10 = int_to_ptr.vmem [resolvable:$true] %s202_s10 }
  0x15   : > { %s2250_s12 = scalar_lea.sflag [#allocation6], %s191_s28 }
  0x16   : > { %p1917_p6 = pneg %p2244_p4 }
  0x19   : > { %s2240_s8 = scalar_lea.hbm %s3445_s1, %s1520_s5  ;;  %s1920_s30 = scalar_lea.hbm %s3445_s1, 4096 }
  0x1a   : > { %s1915_s13 = scalar_lea.hbm %s2240_s8, 2048  ;;  %p1921_p9 = scmp.lt.u32.totalorder %s2240_s8, %s3445_s1 }
  0x1b   : > { %p1916_p5 = scmp.ne.s32.totalorder %s2240_s8, %s1915_s13  ;;  %p1922_p10 = scmp.lt.u32.totalorder %s1920_s30, %s1915_s13 }
  0x1c   : > { %p1924_p12 = scmp.lt.u32.totalorder %s1915_s13, %s2240_s8 }
  0x1d   : > { %p1918_p7 = pnand %p1917_p6, %p1916_p5  ;;  %p1923_p11 = por %p1922_p10, %p1921_p9 }
  0x1f   : > { %p1919_p8 = pneg %p1918_p7  ;;  %p1925_p13 = por %p1924_p12, %p1923_p11 }
  0x21   : > { %p1926_p0 = pnand %p1925_p13, %p1919_p8 }
  0x23   : > { %1929 = shalt.err (!%p1926_p0)
}
  0x24   : > { %s1930_s28 = scalar_lea.vmem %s2248_s10, 2048  ;;  %s2135_s7 = smov [#allocation5]  }
  0x25   : > { %p1931_p3 = scmp.ne.s32.totalorder %s2248_s10, %s1930_s28  ;;  %s1935_s9 = sshll.u32 %s2135_s7, 4  ;;  %s1936_s9 = int_to_ptr.vmem [resolvable:$false] %s1935_s9 }
  0x26   : > { %s1937_s14 = scalar_lea.vmem %s1936_s9, 4096  ;;  %p1938_p2 = scmp.lt.s32.totalorder %s2248_s10, %s1936_s9 }
  0x27   : > { %p1933_p5 = pnand %p1931_p3, %p1917_p6  ;;  %p1939_p9 = scmp.lt.s32.totalorder %s1937_s14, %s1930_s28 }
  0x29   : > { %p1934_p7 = pneg %p1933_p5  ;;  %p1940_p10 = por %p1939_p9, %p1938_p2 }
  0x2b   : > { %p1941_p11 = pnand %p1940_p10, %p1934_p7 }
  0x2d   : > { %1944 = shalt.err (!%p1941_p11)
}
  0x2e   : > { %s2136_s13 = smov 64   ;;  %s2137_s29 = smov 4  }
  0x2f   : > { %1658 = dma.hbm_to_vmem [thread:$0]  (!%p2244_p4), %s2240_s8, 2048, %s2248_s10, %s2250_s12, %s2136_s13, %s2136_s13, %s2137_s29  }
  0x30   : > { %s2279_s30 = sadd.s32 4294967295, %s2133_s25   ;;  %s1461_s5 = sadd.s32 4294967294, %s2133_s25  }
  0x31   : > { %p74_p2 = scmp.ne.s32.totalorder %s2109_s19, %s2105_s18  ;;  %p3404_p6 = scmp.eq.s32.totalorder %s2279_s30, 0 }
  0x32   : > { %p122_p8 = scmp.ne.s32.totalorder %s2101_s17, %s2097_s16  ;;  %p128_p4 = scmp.ne.s32.totalorder %s2097_s16, %s2093_s15 }
  0x33   : > { %p2290_p12 = por %p3404_p6, %p74_p2  ;;  %p154_p0 = scmp.eq.s32.totalorder %s2279_s30, 3 }
  0x34   : > { %p124_p13 = por %p122_p8, %p69_p1  ;;  %p2301_p3 = por %p128_p4, %p3404_p6 }
  0x35   : > { %s3447_s28 = scalar_select %p2290_p12, 1, 0 }
  0x36   : > { %s3448_s8 = scalar_select %p2301_p3, 1, 0 }
  0x37   : > { %p160_p5 = scmp.eq.s32.totalorder %s1461_s5, 3  ;;  %p2305_p7 = por %p154_p0, %p122_p8 }
  0x38   : > { %p1462_p9 = scmp.ge.s32.totalorder %s2133_s25, 1  ;;  %p167_p11 = scmp.lt.s32.totalorder %s2133_s25, 5 }
  0x39   : > { %s3449_s18 = scalar_select %p2305_p7, 1, 0 }
  0x3a   : > { %p2310_p10 = por %p160_p5, %p128_p4  ;;  %p2315_p2 = pnand %p1462_p9, %p167_p11 }
  0x3b   : > { %3450 = sst [smem:[#allocation15_spill]] %s3449_s18  ;;  %s2138_s7 = smov [#allocation2]  }
  0x3c   : > { %s3451_s10 = scalar_select %p2310_p10, 1, 0 }
  0x3d   : > { %s3453_s11 = scalar_select %p2315_p2, 1, 0 }
  0x3e   : > { %3452 = sst [smem:[#allocation16_spill]] %s3451_s10  ;;  %s180_s9 = sshll.u32 %s2138_s7, 4  ;;  %s181_s9 = int_to_ptr.vmem [resolvable:$true] %s180_s9 }
  0x3f   : > { %p3454_p1 = scmp.lt.s32.totalorder %s2133_s25, 4  ;;  %p1651_p8 = pneg %p2315_p2 }
  0x40   : > { %p3456_p4 = scmp.eq.s32.totalorder %s2279_s30, 0  ;;  %s30_s29 = sadd.s32 1, %s2125_s23 }
  0x41   : > { %p2321_p6 = pnand %p3454_p1, %p124_p13  ;;  %p2334_p5 = scmp.ge.s32.totalorder %s30_s29, 2 }
  0x42   : > { %p2329_p0 = pnand %p1651_p8, %p3456_p4  ;;  %s221_s7 = sand.u32 1, %s2101_s17  }
  0x43   : > { %s3455_s14 = scalar_select %p2321_p6, 1, 0 }
  0x44   : > { %s3458_s5 = scalar_select %p2334_p5, 1, 0 }
  0x45   : > { %s1468_s6 = sshll.u32 %s221_s7, 7  ;;  %s3459_s0 = sld [smem:[#allocation32_spill]] }
  0x46   : > { %p1947_p9 = pneg %p2329_p0 }
  0x4b   : > { %s1945_s1 = scalar_lea.hbm %s3459_s0, 16 }
  0x4c   : > { %p1946_p13 = scmp.ne.s32.totalorder %s3459_s0, %s1945_s1  ;;  %p1952_p8 = scmp.lt.u32.totalorder %s1945_s1, %s3459_s0 }
  0x4e   : > { %p1948_p11 = pnand %p1947_p9, %p1946_p13 }
  0x50   : > { %p1949_p1 = pneg %p1948_p11 }
  0x52   : > { %p1954_p4 = pnand %p1952_p8, %p1949_p1 }
  0x54   : > { %1957 = shalt.err (!%p1954_p4)
}
  0x55   : > { %s1958_s18 = scalar_lea.vmem %s181_s9, 16  ;;  %s1965_s26 = scalar_lea.vmem %s181_s9, 32 }
  0x56   : > { %p1959_p10 = scmp.ne.s32.totalorder %s181_s9, %s1958_s18  ;;  %p1966_p12 = scmp.lt.s32.totalorder %s181_s9, %s181_s9 }
  0x57   : > { %p1967_p2 = scmp.lt.s32.totalorder %s1965_s26, %s1958_s18 }
  0x58   : > { %p1961_p7 = pnand %p1959_p10, %p1947_p9 }
  0x59   : > { %p1968_p6 = por %p1967_p2, %p1966_p12 }
  0x5a   : > { %p1962_p3 = pneg %p1961_p7 }
  0x5c   : > { %p1969_p5 = pnand %p1968_p6, %p1962_p3 }
  0x5e   : > { %1972 = shalt.err (!%p1969_p5)
}
  0x5f   : > { %1654 = dma.hbm_to_vmem [thread:$0]  (!%p2329_p0), %s3459_s0, 16, %s181_s9, [#allocation3]  }
  0x60   : > { %p3460_p7 = scmp.ne.s32.totalorder %s3458_s5, 0  ;;  %s3462_s1 = sadd.s32 1, %s2129_s24 }
  0x61   : > { %s1521_s25 = sshll.u32 %s2125_s23, 5  ;;  %s1471_s18 = sshll.u32 %s2129_s24, 6 }
  0x62   : > { %s3602_s29 = smov (%p3460_p7, %s30_s29), 0  ;;  %s3604_s1 = smov (!%p3460_p7, %s3462_s1), %s2129_s24 }
  0x63   : > { %3461 = sst [smem:[#allocation17_spill]] %s3602_s29  ;;  %s111_s4 = ssub.s32 %s2125_s23, %s3602_s29 }
  0x64   : > { %p35_p6 = scmp.ge.s32.totalorder %s3604_s1, 2  ;;  %s223_s10 = scalar_lea.vmem [#allocation7], %s1468_s6 }
  0x65   : > { %s233_s13 = sshll.u32 %s223_s10, 4  ;;  %s230_s9 = sadd.s32 %s1521_s25, %s1471_s18  ;;  %s2370_s13 = int_to_ptr.vmem [resolvable:$true] %s233_s13 }
  0x66   : > { %s3606_s1 = smov (%p35_p6, %s3604_s1), 0  ;;  %s1472_s7 = sshll.u32 %s230_s9, 6 }
  0x67   : > { %s58_s5 = ssub.s32 %s2129_s24, %s3606_s1  ;;  %s2377_s0 = scalar_lea.hbm %s3401_s3, %s1472_s7 }
  0x68   : > { %p59_p12 = scmp.eq.s32.totalorder %s58_s5, 0  ;;  %s112_s26 = sor.u32 %s111_s4, %s58_s5 }
  0x69   : > { %p113_p3 = scmp.eq.s32.totalorder %s112_s26, 0  ;;  %s3463_s29 = sadd.s32 1, %s2113_s20 }
  0x6a   : > { %s2382_s6 = scalar_select %p59_p12, %s2113_s20, %s3463_s29  }
  0x6b   : > { %s3464_s25 = sadd.s32 1, %s2101_s17  ;;  %s1973_s10 = scalar_lea.hbm %s2377_s0, 2048 }
  0x6c   : > { %s2387_s18 = scalar_select %p113_p3, %s2101_s17, %s3464_s25  }
  0x6d   : > { %p1974_p10 = scmp.ne.s32.totalorder %s2377_s0, %s1973_s10  ;;  %p3465_p2 = scmp.ne.s32.totalorder %s3455_s14, 0 }
  0x6e   : > { %s1978_s5 = scalar_lea.hbm %s3401_s3, 8192  ;;  %p1979_p9 = scmp.lt.u32.totalorder %s2377_s0, %s3401_s3 }
  0x6f   : > { %p1975_p0 = pneg %p3465_p2  ;;  %p1980_p11 = scmp.lt.u32.totalorder %s1978_s5, %s1973_s10 }
  0x70   : > { %p1982_p8 = scmp.lt.u32.totalorder %s1973_s10, %s2377_s0 }
  0x71   : > { %p1976_p5 = pnand %p1975_p0, %p1974_p10  ;;  %p1981_p1 = por %p1980_p11, %p1979_p9 }
  0x73   : > { %p1977_p13 = pneg %p1976_p5  ;;  %p1983_p4 = por %p1982_p8, %p1981_p1 }
  0x75   : > { %p1984_p7 = pnand %p1983_p4, %p1977_p13 }
  0x77   : > { %1987 = shalt.err (!%p1984_p7)
}
  0x78   : > { %s1988_s29 = scalar_lea.vmem %s2370_s13, 2048  ;;  %s2139_s15 = smov [#allocation7]  }
  0x79   : > { %p1989_p6 = scmp.ne.s32.totalorder %s2370_s13, %s1988_s29  ;;  %s1993_s27 = sshll.u32 %s2139_s15, 4  ;;  %s1994_s27 = int_to_ptr.vmem [resolvable:$false] %s1993_s27 }
  0x7a   : > { %s1995_s25 = scalar_lea.vmem %s1994_s27, 4096  ;;  %p1996_p10 = scmp.lt.s32.totalorder %s2370_s13, %s1994_s27 }
  0x7b   : > { %p1991_p12 = pnand %p1989_p6, %p1975_p0  ;;  %p1997_p5 = scmp.lt.s32.totalorder %s1995_s25, %s1988_s29 }
  0x7d   : > { %p1992_p3 = pneg %p1991_p12  ;;  %p1998_p9 = por %p1997_p5, %p1996_p10 }
  0x7f   : > { %p1999_p11 = pnand %p1998_p9, %p1992_p3 }
  0x81   : > { %2002 = shalt.err (!%p1999_p11)
}
  0x82   : > { %s2140_s10 = smov 128   ;;  %s2141_s4 = smov 8  }
  0x83   : > { %1661 = dma.hbm_to_vmem [thread:$0]  (!%p3465_p2), %s2377_s0, 2048, %s2370_s13, %s2250_s12, %s2140_s10, %s2140_s10, %s2141_s4  }
  0x84   : > { %p3466_p0 = scmp.ne.s32.totalorder %s3453_s11, 0 }
  0x86   : > { %245 = sbr.rel (%p3466_p0) target bundleno = 776 (0x308), region = 36 }
  0x8d   : > { %p3467_p13 = scmp.eq.s32.totalorder %s2279_s30, 0 }
  0x8f   : > { %2076 = dma.done.wait (%p3467_p13), [#allocation3], 16   ;;  %p3468_p1 = pmov %p3467_p13 }
  0x90   : > { %s251_s9 = sand.u32 1, %s2279_s30   ;;  %s253_s5 = sand.u32 1, %s2109_s19  }
  0x91   : > { %2078 = vsyncadd (%p3468_p1), [#allocation3], 4294967280  ;;  %s1475_s7 = sshll.u32 %s253_s5, 7  ;;  %s252_s26 = scalar_lea.sflag [#allocation6], %s251_s9 }
  0x92   : > { %s2423_s29 = scalar_lea.vmem [#allocation5], %s1475_s7  ;;  %p3469_p8 = scmp.ne.s32.totalorder %s3447_s28, 0 }
  0x94   : > { %2080 = dma.done.wait (%p3469_p8), %s252_s26, 2048  }
  0x95   : > { %2082 = vsyncadd (%p3469_p8), %s252_s26, 4294965248  ;;  %s262_s0 = sand.u32 1, %s2097_s16   ;;  %p3470_p2 = scmp.ne.s32.totalorder %s3448_s8, 0 }
  0x96   : > { %s2432_s12 = sshll.u32 %s262_s0, 7 }
  0x97   : > { %s2435_s11 = scalar_lea.vmem [#allocation7], %s2432_s12 }
  0x98   : > { %2084 = dma.done.wait (%p3470_p2), %s252_s26, 2048  }
  0x99   : > { %2086 = vsyncadd (%p3470_p2), %s252_s26, 4294965248  ;;  %s1479_s30 = sshll.u32 %s2117_s21, 7  ;;  %v1481_v1 = vld [vmem:[#allocation2] ss:$0 sm:$0xff]  ;;  %v1766_v41 = vld [vmem:[%s2423_s29 + $0x40] sm:$0xff]   ;;  %p298_p4 = scmp.lt.s32.totalorder %s2121_s22, 1  ;;  %v401_v45 = vlaneseq }
  0x9a   : > { %s308_s28 = sshra.s32 %s1479_s30, 3  ;;  %v1767_v42 = vld [vmem:[%s2423_s29] sm:$0xff]   ;;  %v1768_v43 = vld [vmem:[%s2423_s29 + $0x48] sm:$0xff]   ;;  %1561 = vmatprep.subr.bf16.mxu0 %v1766_v41  ;;  %1625 = vmatprep.subr.bf16.mxu1 %v1766_v41  ;;  %v2478_v53 = vld [vmem:[%s2435_s11 + $0x10] sm:$0xff]  ;;  %v2142_v56 = vmov 0   ;;  %s3273_s4 = scalar_lea.vmem [#allocation8], %s2432_s12 }
  0x9b   : > { %s1480_s14 = sshll.u32 %s308_s28, 2  ;;  %1562 = vmatpush3.bf16.msra.mxu0 %v1767_v42  ;;  %1633 = vmatpush3.bf16.msra.mxu1 %v1767_v42  ;;  %v1769_v44 = vld [vmem:[%s2423_s29 + $0x8] sm:$0xff]   ;;  %v402_v46 = vshrl.u32 %v401_v45, 7  ;;  %v2460_v47 = vld [vmem:[%s2435_s11] sm:$0xff]  ;;  %v2482_v55 = vld [vmem:[%s2435_s11 + $0x18] sm:$0xff]  ;;  %vm557_vm4 = vcmp.gt.bf16.partialorder %v2478_v53, 0 }
  0x9c   : > { %s2443_s13 = scalar_lea.vmem %s2423_s29, %s1480_s14 [#allocation5]  ;;  %1563 = vmatprep.subr.bf16.mxu0 %v1768_v43  ;;  %1626 = vmatprep.subr.bf16.mxu1 %v1768_v43  ;;  %v2463_v48 = vld [vmem:[%s2435_s11 + $0x40] sm:$0xff]  ;;  %v2466_v49 = vld [vmem:[%s2435_s11 + $0x8] sm:$0xff]  ;;  %vm555_vm0 = vcmp.gt.bf16.partialorder %v2460_v47, 0  ;;  %3471 = vst [vmem:[#allocation18_spill] sm:$0xff] %v2482_v55  ;;  %v2487_v59 = vld [vmem:[%s2435_s11 + $0x50] sm:$0xff]  ;;  %vm558_vm5 = vcmp.gt.bf16.partialorder %v2482_v55, 0 }
  0x9d   : > { %v1523_v0 = vld [vmem:[%s2443_s13] sm:$0xff]   ;;  %v1554_v7 = vld [vmem:[%s2443_s13 + $0x8] sm:$0xff]   ;;  %v1555_v15 = vld [vmem:[%s2443_s13 + $0x10] sm:$0xff]   ;;  %s299_s8 = scalar_select %p298_p4, %s2121_s22, 1  ;;  %vm563_vm1 = vcmp.gt.bf16.partialorder %v2463_v48, 0  ;;  %v403_v51 = vsub.s32 0, %v402_v46 }
  0x9e   : > { %v1557_v2 = vld [vmem:[%s2443_s13 + $0x20] sm:$0xff]   ;;  %v1524_v3 = vunpack.c.l.bf16 %v1523_v0  ;;  %v1525_v5 = vunpack.c.h.bf16 %v1523_v0  ;;  %v1558_v10 = vld [vmem:[%s2443_s13 + $0x28] sm:$0xff]   ;;  %v1528_v13 = vunpack.c.l.bf16 %v1554_v7  ;;  %v1529_v14 = vunpack.c.h.bf16 %v1554_v7  ;;  %v1559_v24 = vld [vmem:[%s2443_s13 + $0x30] sm:$0xff]   ;;  %3472 = vst [vmem:[#allocation19_spill] sm:$0xff] %v2487_v59  ;;  %s1515_s9 = sshll.u32 %s2117_s21, 4  ;;  %s1516_s5 = sshll.u32 %s2121_s22, 5 }
  0x9f   : > { %v1540_v4 = vunpack.c.l.bf16 %v1557_v2  ;;  %v1541_v6 = vunpack.c.h.bf16 %v1557_v2  ;;  %v1544_v18 = vunpack.c.l.bf16 %v1558_v10  ;;  %v1545_v19 = vunpack.c.h.bf16 %v1558_v10  ;;  %v1556_v29 = vld [vmem:[%s2443_s13 + $0x18] sm:$0xff]   ;;  %1564 = vmatpush3.bf16.msra.mxu0 %v1769_v44  ;;  %1634 = vmatpush3.bf16.msra.mxu1 %v1769_v44  ;;  %s1478_s15 = sshll.u32 %s299_s8, 1  ;;  %v2494_v61 = vld [vmem:[%s2435_s11 + $0x58] sm:$0xff]  ;;  %s1321_s7 = sadd.s32 %s1516_s5, %s1515_s9 }
  0xa0   : > { %v351_v8 = vmul.f32 %v1524_v3, %v1481_v1  ;;  %v352_v11 = vmul.f32 %v1525_v5, %v1481_v1  ;;  %v353_v16 = vmul.f32 %v1528_v13, %v1481_v1  ;;  %v354_v17 = vmul.f32 %v1529_v14, %v1481_v1  ;;  %v1560_v34 = vld [vmem:[%s2443_s13 + $0x38] sm:$0xff]   ;;  %s301_s10 = scalar_lea.vmem %s3400_s2, %s1478_s15  ;;  %3473 = vst [vmem:[#allocation20_spill] sm:$0xff] %v2494_v61  ;;  %s1324_s26 = sshll.u32 %s3273_s4, 4  ;;  %s3327_s26 = int_to_ptr.vmem [resolvable:$true] %s1324_s26 }
  0xa1   : > { %v359_v9 = vmul.f32 %v1540_v4, %v1481_v1  ;;  %v360_v12 = vmul.f32 %v1541_v6, %v1481_v1  ;;  %v361_v20 = vmul.f32 %v1544_v18, %v1481_v1  ;;  %v362_v21 = vmul.f32 %v1545_v19, %v1481_v1  ;;  %v2472_v50 = vld [vmem:[%s2435_s11 + $0x48] sm:$0xff]  ;;  %v399_v54 = vld [vmem:[%s301_s10] sm:$0x3]  ;;  %v2512_v6 = vld [vmem:[%s2435_s11 + $0x60] sm:$0xff]  ;;  %s1517_s21 = sshll.u32 %s1321_s7, 7  ;;  %s3337_s28 = scalar_lea.sflag [#allocation4], %s262_s0 }
  0xa2   : > { %367 = vadd.xlane.f32.xlu0 %v351_v8  ;;  %v1532_v22 = vunpack.c.l.bf16 %v1555_v15  ;;  %v1533_v23 = vunpack.c.h.bf16 %v1555_v15  ;;  %v1548_v27 = vunpack.c.l.bf16 %v1559_v24  ;;  %v1549_v28 = vunpack.c.h.bf16 %v1559_v24  ;;  %v2509_v5 = vld [vmem:[%s2435_s11 + $0x28] sm:$0xff]  ;;  %3476 = vst [vmem:[#allocation23_spill] sm:$0xff] %v2512_v6  ;;  %v545_v14 = vld [vmem:[%s2435_s11 + $0x30] sm:$0xff]  ;;  %s2003_s14 = scalar_lea.vmem %s3327_s26, 2048  ;;  %s2143_s13 = smov [#allocation8]  }
  0xa3   : > { %383 = vadd.xlane.f32.xlu1 %v359_v9  ;;  %v1536_v32 = vunpack.c.l.bf16 %v1556_v29  ;;  %v1537_v33 = vunpack.c.h.bf16 %v1556_v29  ;;  %v1552_v37 = vunpack.c.l.bf16 %v1560_v34  ;;  %v1553_v38 = vunpack.c.h.bf16 %v1560_v34  ;;  %3475 = vst [vmem:[#allocation22_spill] sm:$0xff] %v2509_v5  ;;  %v2520_v10 = vld [vmem:[%s2435_s11 + $0x68] sm:$0xff]  ;;  %p2004_p7 = scmp.ne.s32.totalorder %s3327_s26, %s2003_s14  ;;  %s2007_s8 = sshll.u32 %s2143_s13, 4  ;;  %s2008_s8 = int_to_ptr.vmem [resolvable:$false] %s2007_s8 }
  0xa4   : > { %v355_v25 = vmul.f32 %v1532_v22, %v1481_v1  ;;  %v356_v26 = vmul.f32 %v1533_v23, %v1481_v1  ;;  %v363_v30 = vmul.f32 %v1548_v27, %v1481_v1  ;;  %v364_v31 = vmul.f32 %v1549_v28, %v1481_v1  ;;  %3477 = vst [vmem:[#allocation24_spill] sm:$0xff] %v2520_v10  ;;  %s2009_s15 = scalar_lea.vmem %s2008_s8, 4096  ;;  %p2010_p10 = scmp.lt.s32.totalorder %s3327_s26, %s2008_s8 }
  0xa5   : > { %v357_v35 = vmul.f32 %v1536_v32, %v1481_v1  ;;  %v358_v36 = vmul.f32 %v1537_v33, %v1481_v1  ;;  %v365_v39 = vmul.f32 %v1552_v37, %v1481_v1  ;;  %v366_v40 = vmul.f32 %v1553_v38, %v1481_v1  ;;  %v2505_v1 = vld [vmem:[%s2435_s11 + $0x20] sm:$0xff]  ;;  %p2011_p5 = scmp.lt.s32.totalorder %s2009_s15, %s2003_s14 }
  0xa6   : > { %369 = vadd.xlane.f32.xlu0 %v352_v11  ;;  %v407_v52 = vsub.s32 1, %v402_v46  ;;  %vm556_vm2 = vcmp.gt.bf16.partialorder %v2466_v49, 0  ;;  %vm564_vm3 = vcmp.gt.bf16.partialorder %v2472_v50, 0  ;;  %v571_v57 = vsel %vm555_vm0, 65537, %v2142_v56  ;;  %3474 = vst [vmem:[#allocation21_spill] sm:$0xff] %v2505_v1 }
  0xa7   : > { %385 = vadd.xlane.f32.xlu1 %v360_v12  ;;  %v579_v58 = vsel %vm563_vm1, 65537, %v2142_v56  ;;  %v2490_v60 = vsel %vm556_vm2, 65537, %v2142_v56  ;;  %v2496_v62 = vrot.slane %v399_v54, %v403_v51  ;;  %v2501_v0 = vsel %vm564_vm3, 65537, %v2142_v56  ;;  %p2012_p9 = por %p2011_p5, %p2010_p10 }
  0xa8   : > { %v2498_v63 = vrot.slane %v399_v54, %v407_v52  ;;  %v587_v2 = vunpack.c.l.b16 %v571_v57  ;;  %v588_v3 = vunpack.c.h.b16 %v571_v57  ;;  %v603_v4 = vunpack.c.l.b16 %v579_v58 }
  0xa9   : > { %vm565_vm6 = vcmp.gt.bf16.partialorder %v2487_v59, 0  ;;  %v604_v7 = vunpack.c.h.b16 %v579_v58  ;;  %v589_v8 = vunpack.c.l.b16 %v2490_v60  ;;  %v2516_v9 = vsel %vm557_vm4, 65537, %v2142_v56 }
  0xaa   : > { %371 = vadd.xlane.f32.xlu0 %v353_v16  ;;  %vm566_vm7 = vcmp.gt.bf16.partialorder %v2494_v61, 0  ;;  %v590_v11 = vunpack.c.h.b16 %v2490_v60  ;;  %v605_v12 = vunpack.c.l.b16 %v2501_v0  ;;  %v2525_v13 = vsel %vm558_vm5, 65537, %v2142_v56 }
  0xab   : > { %373 = vadd.xlane.f32.xlu1 %v354_v17  ;;  %vm559_vm8 = vcmp.gt.bf16.partialorder %v2505_v1, 0  ;;  %v606_v15 = vunpack.c.h.b16 %v2501_v0  ;;  %v2531_v16 = vsel %vm565_vm6, 65537, %v2142_v56  ;;  %vm560_vm9 = vcmp.gt.bf16.partialorder %v2509_v5, 0 }
  0xac   : > { %vm567_vm10 = vcmp.gt.bf16.partialorder %v2512_v6, 0  ;;  %v591_v17 = vunpack.c.l.b16 %v2516_v9  ;;  %v592_v18 = vunpack.c.h.b16 %v2516_v9  ;;  %v2538_v19 = vsel %vm566_vm7, 65537, %v2142_v56 }
  0xad   : > { %vm568_vm11 = vcmp.gt.bf16.partialorder %v2520_v10, 0  ;;  %v593_v22 = vunpack.c.l.b16 %v2525_v13  ;;  %v594_v23 = vunpack.c.h.b16 %v2525_v13  ;;  %v2546_v24 = vsel %vm559_vm8, 65537, %v2142_v56 }
  0xae   : > { %387 = vadd.xlane.f32.xlu0 %v361_v20  ;;  %v546_v20 = vld [vmem:[%s2435_s11 + $0x38] sm:$0xff]  ;;  %vm561_vm12 = vcmp.gt.bf16.partialorder %v545_v14, 0  ;;  %v608_v27 = vunpack.c.h.b16 %v2531_v16  ;;  %v2552_v28 = vsel %vm560_vm9, 65537, %v2142_v56  ;;  %v2555_v29 = vsel %vm567_vm10, 65537, %v2142_v56 }
  0xaf   : > { %389 = vadd.xlane.f32.xlu1 %v362_v21  ;;  %v553_v21 = vld [vmem:[%s2435_s11 + $0x70] sm:$0xff]  ;;  %vm562_vm13 = vcmp.gt.bf16.partialorder %v546_v20, 0  ;;  %vm2561_vm15 = vcmp.ne.s32.totalorder %v587_v2, 0  ;;  %vm2565_vm0 = vcmp.ne.s32.totalorder %v588_v3, 0  ;;  %vm2578_vm2 = vcmp.ne.s32.totalorder %v603_v4, 0 }
  0xb0   : > { %vm569_vm14 = vcmp.gt.bf16.partialorder %v553_v21, 0  ;;  %vm2582_vm3 = vcmp.ne.s32.totalorder %v604_v7, 0  ;;  %v2590_v45 = vsel %vm562_vm13, 65537, %v2142_v56  ;;  %vm2607_vm4 = vcmp.ne.s32.totalorder %v589_v8, 0 }
  0xb1   : > { %v2594_v46 = vsel %vm569_vm14, 65537, %v2142_v56  ;;  %vm2615_vm5 = vcmp.ne.s32.totalorder %v590_v11, 0  ;;  %vm2626_vm9 = vcmp.ne.s32.totalorder %v605_v12, 0  ;;  %vm2660_vm13 = vcmp.ne.s32.totalorder %v592_v18, 0 }
  0xb2   : > { %375 = vadd.xlane.f32.xlu0 %v355_v25  ;;  %v554_v25 = vld [vmem:[%s2435_s11 + $0x78] sm:$0xff]  ;;  %v3506_v11 = vunpack.c.l.b16 %v2538_v19  ;;  %v3518_v59 = vunpack.c.l.b16 %v2552_v28  ;;  %v3523_v42 = vunpack.c.h.b16 %v2552_v28  ;;  %v3529_v28 = vunpack.c.h.b16 %v2555_v29 }
  0xb3   : > { %377 = vadd.xlane.f32.xlu1 %v356_v26  ;;  %v607_v26 = vunpack.c.l.b16 %v2531_v16  ;;  %vm570_vm1 = vcmp.gt.bf16.partialorder %v554_v25, 0 }
  0xb4   : > { %v2601_v60 = vsel %vm570_vm1, 65537, %v2142_v56  ;;  %vm2681_vm1 = vcmp.ne.s32.totalorder %v593_v22, 0  ;;  %v3526_v22 = vunpack.c.l.b16 %v2555_v29 }
  0xb6   : > { %391 = vadd.xlane.f32.xlu0 %v363_v30 }
  0xb7   : > { %393 = vadd.xlane.f32.xlu1 %v364_v31  ;;  %v2559_v31 = vsel %vm568_vm11, 65537, %v2142_v56  ;;  %vm2632_vm11 = vcmp.ne.s32.totalorder %v606_v15, 0 }
  0xba   : > { %379 = vadd.xlane.f32.xlu0 %v357_v35 }
  0xbb   : > { %381 = vadd.xlane.f32.xlu1 %v358_v36  ;;  %v2572_v36 = vsel %vm561_vm12, 65537, %v2142_v56  ;;  %vm2646_vm12 = vcmp.ne.s32.totalorder %v591_v17, 0 }
  0xbe   : > { %395 = vadd.xlane.f32.xlu0 %v365_v39 }
  0xbf   : > { %397 = vadd.xlane.f32.xlu1 %v366_v40 }
 0x12f   : > { %v368_v51 = vpop.xlane.xlu0 %367 }
 0x130   : > { %v384_v52 = vpop.xlane.xlu1 %383  ;;  %v411_v2 = vadd.f32 %v2496_v62, %v368_v51  ;;  %v412_v3 = vadd.f32 %v2498_v63, %v368_v51 }
 0x131   : > { %v427_v4 = vadd.f32 %v2496_v62, %v384_v52  ;;  %v428_v7 = vadd.f32 %v2498_v63, %v384_v52 }
 0x132   : > { %v475_v58 = vmul.f32 0.2, %v411_v2  ;;  %v476_v57 = vmul.f32 0.2, %v412_v3  ;;  %vm443_vm6 = vcmp.gt.f32.partialorder %v411_v2, 0.0  ;;  %vm444_vm7 = vcmp.gt.f32.partialorder %v412_v3, 0.0 }
 0x133   : > { %v491_v54 = vmul.f32 0.2, %v427_v4  ;;  %v492_v52 = vmul.f32 0.2, %v428_v7  ;;  %v370_v44 = vpop.xlane.xlu0 %369  ;;  %vm459_vm8 = vcmp.gt.f32.partialorder %v427_v4, 0.0  ;;  %vm460_vm10 = vcmp.gt.f32.partialorder %v428_v7, 0.0 }
 0x134   : > { %v386_v43 = vpop.xlane.xlu1 %385  ;;  %v413_v21 = vadd.f32 %v2496_v62, %v370_v44  ;;  %v414_v25 = vadd.f32 %v2498_v63, %v370_v44  ;;  %v507_v8 = vsel %vm443_vm6, %v411_v2, %v475_v58  ;;  %v508_v40 = vsel %vm444_vm7, %v412_v3, %v476_v57 }
 0x135   : > { %v429_v56 = vadd.f32 %v2496_v62, %v386_v43  ;;  %v430_v20 = vadd.f32 %v2498_v63, %v386_v43  ;;  %v523_v39 = vsel %vm459_vm8, %v427_v4, %v491_v54  ;;  %v524_v43 = vsel %vm460_vm10, %v428_v7, %v492_v52 }
 0x136   : > { %v477_v44 = vmul.f32 0.2, %v413_v21  ;;  %v478_v37 = vmul.f32 0.2, %v414_v25  ;;  %v2638_v12 = vsel %vm2561_vm15, %v507_v8, -9e+15 }
 0x137   : > { %v493_v35 = vmul.f32 0.2, %v429_v56  ;;  %v494_v34 = vmul.f32 0.2, %v430_v20  ;;  %v372_v30 = vpop.xlane.xlu0 %371  ;;  %v2642_v57 = vsel %vm2565_vm0, %v508_v40, -9e+15 }
 0x138   : > { %v374_v54 = vpop.xlane.xlu1 %373  ;;  %v415_v58 = vadd.f32 %v2496_v62, %v372_v30  ;;  %v416_v2 = vadd.f32 %v2498_v63, %v372_v30  ;;  %v683_v32 = vmax.f32 %v2638_v12, %v2642_v57  ;;  %v2669_v3 = vsel %vm2578_vm2, %v523_v39, -9e+15 }
 0x139   : > { %v2656_v33 = vadd.f32 %v2496_v62, %v374_v54  ;;  %v2665_v17 = vadd.f32 %v2498_v63, %v374_v54  ;;  %v2673_v30 = vsel %vm2582_vm3, %v524_v43, -9e+15  ;;  %vm445_vm14 = vcmp.gt.f32.partialorder %v413_v21, 0.0 }
 0x13a   : > { %v479_v4 = vmul.f32 0.2, %v415_v58  ;;  %v480_v7 = vmul.f32 0.2, %v416_v2  ;;  %684 = vmax.xlane.f32.xlu0 %v683_v32  ;;  %v707_v18 = vmax.f32 %v2669_v3, %v2673_v30  ;;  %vm446_vm15 = vcmp.gt.f32.partialorder %v414_v25, 0.0 }
 0x13b   : > { %v481_v9 = vmul.f32 0.2, %v2656_v33  ;;  %v482_v8 = vmul.f32 0.2, %v2665_v17  ;;  %v388_v52 = vpop.xlane.xlu0 %387  ;;  %v509_v41 = vsel %vm445_vm14, %v413_v21, %v477_v44  ;;  %vm461_vm0 = vcmp.gt.f32.partialorder %v429_v56, 0.0 }
 0x13c   : > { %v390_v39 = vpop.xlane.xlu1 %389  ;;  %v431_v43 = vadd.f32 %v2496_v62, %v388_v52  ;;  %v2687_v54 = vadd.f32 %v2498_v63, %v388_v52  ;;  %v510_v32 = vsel %vm446_vm15, %v414_v25, %v478_v37  ;;  %v2691_v15 = vsel %vm2607_vm4, %v509_v41, -9e+15 }
 0x13d   : > { %vm2695_vm2 = vcmp.ne.s32.totalorder %v594_v23, 0  ;;  %vm2701_vm3 = vcmp.ne.s32.totalorder %v607_v26, 0  ;;  %v2707_v44 = vsel %vm2615_vm5, %v510_v32, -9e+15  ;;  %v2710_v37 = vadd.f32 %v2496_v62, %v390_v39 }
 0x13e   : > { %v2713_v14 = vadd.f32 %v2498_v63, %v390_v39  ;;  %vm462_vm4 = vcmp.gt.f32.partialorder %v430_v20, 0.0  ;;  %v495_v13 = vmul.f32 0.2, %v431_v43  ;;  %v496_v23 = vmul.f32 0.2, %v2687_v54  ;;  %708 = vmax.xlane.f32.xlu0 %v707_v18 }
 0x13f   : > { %v686_v26 = vmax.f32 %v2691_v15, %v2707_v44  ;;  %v525_v25 = vsel %vm461_vm0, %v429_v56, %v493_v35  ;;  %vm2721_vm5 = vcmp.ne.s32.totalorder %v608_v27, 0  ;;  %v2726_v52 = vmul.f32 0.2, %v2710_v37  ;;  %v376_v39 = vpop.xlane.xlu0 %375 }
 0x140   : > { %v2729_v41 = vmul.f32 0.2, %v2713_v14  ;;  %v526_v32 = vsel %vm462_vm4, %v430_v20, %v494_v34  ;;  %v2733_v18 = vsel %vm2626_vm9, %v525_v25, -9e+15  ;;  %v378_v10 = vpop.xlane.xlu1 %377  ;;  %v2736_v16 = vadd.f32 %v2496_v62, %v376_v39 }
 0x141   : > { %687 = vmax.xlane.f32.xlu1 %v686_v26  ;;  %v2739_v27 = vadd.f32 %v2498_v63, %v376_v39  ;;  %v2743_v35 = vsel %vm2632_vm11, %v526_v32, -9e+15  ;;  %vm447_vm6 = vcmp.gt.f32.partialorder %v415_v58, 0.0  ;;  %vm448_vm7 = vcmp.gt.f32.partialorder %v416_v2, 0.0 }
 0x142   : > { %v710_v34 = vmax.f32 %v2733_v18, %v2743_v35  ;;  %v511_v20 = vsel %vm447_vm6, %v415_v58, %v479_v4  ;;  %v2748_v56 = vadd.f32 %v2496_v62, %v378_v10  ;;  %vm2752_vm8 = vcmp.ne.s32.totalorder %v3506_v11, 0 }
 0x143   : > { %v3509_v25 = vunpack.c.h.b16 %v2538_v19  ;;  %v483_v39 = vmul.f32 0.2, %v2736_v16  ;;  %v2764_v32 = vmul.f32 0.2, %v2739_v27  ;;  %v512_v58 = vsel %vm448_vm7, %v416_v2, %v480_v7  ;;  %v392_v2 = vpop.xlane.xlu0 %391 }
 0x144   : > { %v2768_v4 = vsel %vm2646_vm12, %v511_v20, -9e+15  ;;  %v3512_v11 = vunpack.c.l.b16 %v2546_v24  ;;  %v2778_v19 = vsel %vm2660_vm13, %v512_v58, -9e+15  ;;  %v2784_v5 = vmul.f32 0.2, %v2748_v56  ;;  %v394_v0 = vpop.xlane.xlu1 %393 }
 0x145   : > { %vm2758_vm9 = vcmp.ne.s32.totalorder %v3509_v25, 0  ;;  %v2781_v25 = vadd.f32 %v2498_v63, %v378_v10  ;;  %vm449_vm11 = vcmp.gt.f32.partialorder %v2656_v33, 0.0  ;;  %v3515_v7 = vunpack.c.h.b16 %v2546_v24  ;;  %711 = vmax.xlane.f32.xlu1 %v710_v34 }
 0x146   : > { %vm2772_vm10 = vcmp.ne.s32.totalorder %v3512_v11, 0  ;;  %v689_v40 = vmax.f32 %v2768_v4, %v2778_v19  ;;  %v2796_v10 = vadd.f32 %v2496_v62, %v392_v2  ;;  %v2799_v58 = vadd.f32 %v2498_v63, %v392_v2 }
 0x147   : > { %vm2789_vm12 = vcmp.ne.s32.totalorder %v3515_v7, 0  ;;  %vm450_vm13 = vcmp.gt.f32.partialorder %v2665_v17, 0.0  ;;  %v2803_v11 = vmul.f32 0.2, %v2781_v25  ;;  %v513_v24 = vsel %vm449_vm11, %v2656_v33, %v481_v9 }
 0x148   : > { %v514_v7 = vsel %vm450_vm13, %v2665_v17, %v482_v8  ;;  %vm463_vm14 = vcmp.gt.f32.partialorder %v431_v43, 0.0  ;;  %690 = vmax.xlane.f32.xlu0 %v689_v40  ;;  %v2808_v34 = vmul.f32 0.2, %v2796_v10  ;;  %v2811_v1 = vmul.f32 0.2, %v2799_v58  ;;  %v380_v8 = vpop.xlane.xlu0 %379 }
 0x149   : > { %v2815_v2 = vsel %vm2681_vm1, %v513_v24, -9e+15  ;;  %v527_v61 = vsel %vm463_vm14, %v431_v43, %v495_v13  ;;  %vm2819_vm15 = vcmp.ne.s32.totalorder %v3518_v59, 0  ;;  %v2825_v33 = vsel %vm2695_vm2, %v514_v7, -9e+15  ;;  %v382_v7 = vpop.xlane.xlu1 %381 }
 0x14a   : > { %3521 = vst [vmem:[#allocation25_spill] sm:$0xff] %v2825_v33  ;;  %vm464_vm0 = vcmp.gt.f32.partialorder %v2687_v54, 0.0  ;;  %v2830_v17 = vsel %vm2701_vm3, %v527_v61, -9e+15  ;;  %v2833_v9 = vadd.f32 %v2496_v62, %v394_v0  ;;  %vm2837_vm1 = vcmp.ne.s32.totalorder %v3523_v42, 0 }
 0x14b   : > { %3522 = vst [vmem:[#allocation26_spill] sm:$0xff] %v2830_v17  ;;  %v692_v43 = vmax.f32 %v2815_v2, %v2825_v33  ;;  %v528_v21 = vsel %vm464_vm0, %v2687_v54, %v496_v23  ;;  %v2845_v13 = vadd.f32 %v2498_v63, %v394_v0  ;;  %v2848_v61 = vadd.f32 %v2496_v62, %v380_v8  ;;  %v1774_v33 = vld [vmem:[%s2423_s29 + $0x60] sm:$0xff]  }
 0x14c   : > { %vm2852_vm2 = vcmp.ne.s32.totalorder %v3526_v22, 0  ;;  %vm2858_vm3 = vcmp.ne.s32.totalorder %v3529_v28, 0  ;;  %v2864_v54 = vsel %vm2721_vm5, %v528_v21, -9e+15  ;;  %v2867_v23 = vmul.f32 0.2, %v2833_v9  ;;  %v396_v22 = vpop.xlane.xlu0 %395 }
 0x14d   : > { %3532 = vst [vmem:[#allocation27_spill] sm:$0xff] %v2864_v54  ;;  %v2870_v0 = vadd.f32 %v2498_v63, %v380_v8  ;;  %vm465_vm4 = vcmp.gt.f32.partialorder %v2710_v37, 0.0  ;;  %693 = vmax.xlane.f32.xlu1 %v692_v43  ;;  %v713_v29 = vmax.f32 %v2830_v17, %v2864_v54  ;;  %v2876_v42 = vmul.f32 0.2, %v2845_v13 }
 0x14e   : > { %v2879_v51 = vmul.f32 0.2, %v2848_v61  ;;  %vm466_vm5 = vcmp.gt.f32.partialorder %v2713_v14, 0.0  ;;  %v529_v8 = vsel %vm465_vm4, %v2710_v37, %v2726_v52  ;;  %vm451_vm6 = vcmp.gt.f32.partialorder %v2736_v16, 0.0 }
 0x14f   : > { %v2883_v21 = vmul.f32 0.2, %v2870_v0  ;;  %v530_v43 = vsel %vm466_vm5, %v2713_v14, %v2729_v41  ;;  %v3533_v28 = vunpack.c.l.b16 %v2559_v31  ;;  %v3536_v17 = vunpack.c.h.b16 %v2559_v31  ;;  %714 = vmax.xlane.f32.xlu0 %v713_v29 }
 0x150   : > { %v2904_v37 = vsel %vm2752_vm8, %v529_v8, -9e+15  ;;  %v2908_v14 = vsel %vm2758_vm9, %v530_v43, -9e+15  ;;  %vm452_vm13 = vcmp.gt.f32.partialorder %v2739_v27, 0.0  ;;  %v515_v52 = vsel %vm451_vm6, %v2736_v16, %v483_v39  ;;  %v1770_v8 = vld [vmem:[%s2423_s29 + $0x50] sm:$0xff]  }
 0x151   : > { %vm2892_vm7 = vcmp.ne.s32.totalorder %v3533_v28, 0  ;;  %vm2898_vm11 = vcmp.ne.s32.totalorder %v3536_v17, 0  ;;  %3539 = vst [vmem:[#allocation28_spill] sm:$0xff] %v2904_v37  ;;  %3540 = vst [vmem:[#allocation29_spill] sm:$0xff] %v2908_v14  ;;  %v3541_v41 = vunpack.c.l.b16 %v2572_v36  ;;  %v716_v17 = vmax.f32 %v2904_v37, %v2908_v14  ;;  %v1771_v43 = vld [vmem:[%s2423_s29 + $0x10] sm:$0xff]   ;;  %1565 = vmatprep.subr.bf16.mxu0 %v1770_v8  ;;  %1627 = vmatprep.subr.bf16.mxu1 %v1770_v8 }
 0x152   : > { %v516_v26 = vsel %vm452_vm13, %v2739_v27, %v2764_v32  ;;  %v2924_v38 = vsel %vm2772_vm10, %v515_v52, -9e+15  ;;  %v2927_v29 = vadd.f32 %v2496_v62, %v382_v7  ;;  %v3545_v16 = vunpack.c.h.b16 %v2572_v36  ;;  %1566 = vmatpush3.bf16.msra.mxu0 %v1771_v43  ;;  %1635 = vmatpush3.bf16.msra.mxu1 %v1771_v43 }
 0x153   : > { %vm2914_vm14 = vcmp.ne.s32.totalorder %v3541_v41, 0  ;;  %3544 = vst [vmem:[#allocation30_spill] sm:$0xff] %v2924_v38  ;;  %v2939_v28 = vsel %vm2789_vm12, %v516_v26, -9e+15  ;;  %v2942_v27 = vadd.f32 %v2498_v63, %v382_v7  ;;  %v2945_v6 = vadd.f32 %v2496_v62, %v396_v22  ;;  %717 = vmax.xlane.f32.xlu1 %v716_v17  ;;  %v398_v7 = vpop.xlane.xlu1 %397 }
 0x154   : > { %vm2931_vm8 = vcmp.ne.s32.totalorder %v3545_v16, 0  ;;  %3548 = vst [vmem:[#allocation31_spill] sm:$0xff] %v2939_v28  ;;  %v2948_v32 = vadd.f32 %v2498_v63, %v396_v22  ;;  %v3549_v36 = vunpack.c.l.b16 %v2590_v45  ;;  %v695_v20 = vmax.f32 %v2924_v38, %v2939_v28 }
 0x155   : > { %v489_v41 = vmul.f32 0.2, %v2927_v29  ;;  %vm453_vm10 = vcmp.gt.f32.partialorder %v2748_v56, 0.0  ;;  %vm454_vm12 = vcmp.gt.f32.partialorder %v2781_v25, 0.0  ;;  %v3552_v22 = vunpack.c.h.b16 %v2590_v45 }
 0x156   : > { %vm2952_vm9 = vcmp.ne.s32.totalorder %v3549_v36, 0  ;;  %v490_v16 = vmul.f32 0.2, %v2942_v27  ;;  %v503_v17 = vmul.f32 0.2, %v2945_v6  ;;  %v517_v28 = vsel %vm453_vm10, %v2748_v56, %v2784_v5  ;;  %696 = vmax.xlane.f32.xlu0 %v695_v20 }
 0x157   : > { %vm2963_vm0 = vcmp.ne.s32.totalorder %v3552_v22, 0  ;;  %v504_v36 = vmul.f32 0.2, %v2948_v32  ;;  %v3555_v38 = vunpack.c.l.b16 %v2594_v46  ;;  %v3558_v45 = vunpack.c.h.b16 %v2594_v46  ;;  %v1778_v22 = vld [vmem:[%s2423_s29 + $0x70] sm:$0xff]  }
 0x158   : > { %v518_v37 = vsel %vm454_vm12, %v2781_v25, %v2803_v11  ;;  %v2988_v5 = vsel %vm2819_vm15, %v517_v28, -9e+15  ;;  %vm467_vm6 = vcmp.gt.f32.partialorder %v2796_v10, 0.0  ;;  %vm468_vm13 = vcmp.gt.f32.partialorder %v2799_v58, 0.0 }
 0x159   : > { %vm2974_vm4 = vcmp.ne.s32.totalorder %v3555_v38, 0  ;;  %vm2980_vm5 = vcmp.ne.s32.totalorder %v3558_v45, 0  ;;  %v2994_v46 = vsel %vm2837_vm1, %v518_v37, -9e+15  ;;  %v531_v56 = vsel %vm467_vm6, %v2796_v10, %v2808_v34  ;;  %v1772_v34 = vld [vmem:[%s2423_s29 + $0x58] sm:$0xff]  }
 0x15a   : > { %v532_v25 = vsel %vm468_vm13, %v2799_v58, %v2811_v1  ;;  %v441_v55 = vadd.f32 %v2496_v62, %v398_v7  ;;  %v3561_v11 = vunpack.c.l.b16 %v2601_v60  ;;  %v3564_v8 = vunpack.c.h.b16 %v2601_v60  ;;  %v1773_v37 = vld [vmem:[%s2423_s29 + $0x18] sm:$0xff]   ;;  %1567 = vmatprep.subr.bf16.mxu0 %v1772_v34  ;;  %1628 = vmatprep.subr.bf16.mxu1 %v1772_v34 }
 0x15b   : > { %v698_v10 = vmax.f32 %v2988_v5, %v2994_v46  ;;  %v3017_v1 = vsel %vm2852_vm2, %v531_v56, -9e+15  ;;  %v3021_v62 = vsel %vm2858_vm3, %v532_v25, -9e+15  ;;  %v442_v58 = vadd.f32 %v2498_v63, %v398_v7  ;;  %1568 = vmatpush3.bf16.msra.mxu0 %v1773_v37  ;;  %1636 = vmatpush3.bf16.msra.mxu1 %v1773_v37  ;;  %v1779_v56 = vld [vmem:[%s2423_s29 + $0x30] sm:$0xff]   ;;  %v1780_v25 = vld [vmem:[%s2423_s29 + $0x78] sm:$0xff]  }
 0x15c   : > { %vm3003_vm15 = vcmp.ne.s32.totalorder %v3561_v11, 0  ;;  %vm3009_vm10 = vcmp.ne.s32.totalorder %v3564_v8, 0  ;;  %v719_v60 = vmax.f32 %v3017_v1, %v3021_v62  ;;  %v505_v43 = vmul.f32 0.2, %v441_v55  ;;  %1569 = vmatprep.subr.bf16.mxu0 %v1774_v33  ;;  %1629 = vmatprep.subr.bf16.mxu1 %v1774_v33 }
 0x15d   : > { %vm469_vm1 = vcmp.gt.f32.partialorder %v2833_v9, 0.0  ;;  %vm470_vm12 = vcmp.gt.f32.partialorder %v2845_v13, 0.0  ;;  %699 = vmax.xlane.f32.xlu1 %v698_v10  ;;  %v506_v40 = vmul.f32 0.2, %v442_v58  ;;  %vm455_vm2 = vcmp.gt.f32.partialorder %v2848_v61, 0.0 }
 0x15e   : > { %v533_v24 = vsel %vm469_vm1, %v2833_v9, %v2867_v23  ;;  %v534_v28 = vsel %vm470_vm12, %v2845_v13, %v2876_v42  ;;  %720 = vmax.xlane.f32.xlu0 %v719_v60  ;;  %vm456_vm3 = vcmp.gt.f32.partialorder %v2870_v0, 0.0  ;;  %v519_v9 = vsel %vm455_vm2, %v2848_v61, %v2879_v51 }
 0x15f   : > { %v3037_v63 = vsel %vm2892_vm7, %v533_v24, -9e+15  ;;  %v3041_v20 = vsel %vm2898_vm11, %v534_v28, -9e+15  ;;  %v520_v23 = vsel %vm456_vm3, %v2870_v0, %v2883_v21  ;;  %v3052_v54 = vsel %vm2914_vm14, %v519_v9, -9e+15 }
 0x160   : > { %v722_v13 = vmax.f32 %v3037_v63, %v3041_v20  ;;  %vm457_vm7 = vcmp.gt.f32.partialorder %v2927_v29, 0.0  ;;  %v3058_v42 = vsel %vm2931_vm8, %v520_v23, -9e+15  ;;  %vm458_vm11 = vcmp.gt.f32.partialorder %v2942_v27, 0.0  ;;  %v1775_v0 = vld [vmem:[%s2423_s29 + $0x20] sm:$0xff]  }
 0x161   : > { %v521_v61 = vsel %vm457_vm7, %v2927_v29, %v489_v41  ;;  %vm471_vm6 = vcmp.gt.f32.partialorder %v2945_v6, 0.0  ;;  %v701_v51 = vmax.f32 %v3052_v54, %v3058_v42  ;;  %v522_v21 = vsel %vm458_vm11, %v2942_v27, %v490_v16  ;;  %1570 = vmatpush3.bf16.msra.mxu0 %v1775_v0  ;;  %1637 = vmatpush3.bf16.msra.mxu1 %v1775_v0 }
 0x162   : > { %723 = vmax.xlane.f32.xlu1 %v722_v13  ;;  %v3069_v31 = vsel %vm2952_vm9, %v521_v61, -9e+15  ;;  %vm472_vm14 = vcmp.gt.f32.partialorder %v2948_v32, 0.0  ;;  %v3074_v29 = vsel %vm2963_vm0, %v522_v21, -9e+15  ;;  %v535_v39 = vsel %vm471_vm6, %v2945_v6, %v503_v17  ;;  %v1776_v6 = vld [vmem:[%s2423_s29 + $0x68] sm:$0xff]  }
 0x163   : > { %v536_v41 = vsel %vm472_vm14, %v2948_v32, %v504_v36  ;;  %vm473_vm8 = vcmp.gt.f32.partialorder %v441_v55, 0.0  ;;  %702 = vmax.xlane.f32.xlu0 %v701_v51  ;;  %v704_v27 = vmax.f32 %v3069_v31, %v3074_v29  ;;  %v3082_v52 = vsel %vm2974_vm4, %v535_v39, -9e+15  ;;  %v1777_v17 = vld [vmem:[%s2423_s29 + $0x28] sm:$0xff]   ;;  %1571 = vmatprep.subr.bf16.mxu0 %v1776_v6 }
 0x164   : > { %v3086_v7 = vsel %vm2980_vm5, %v536_v41, -9e+15  ;;  %vm474_vm9 = vcmp.gt.f32.partialorder %v442_v58, 0.0  ;;  %v537_v26 = vsel %vm473_vm8, %v441_v55, %v505_v43  ;;  %1630 = vmatprep.subr.bf16.mxu1 %v1776_v6  ;;  %v1781_v55 = vld [vmem:[%s2423_s29 + $0x38] sm:$0xff]   ;;  %v892_v13 = vunpack.c.h.bf16 %v2460_v47  ;;  %s3583_s29 = sld [smem:[#allocation15_spill]] }
 0x165   : > { %v725_v32 = vmax.f32 %v3082_v52, %v3086_v7  ;;  %v538_v16 = vsel %vm474_vm9, %v442_v58, %v506_v40  ;;  %v3094_v14 = vsel %vm3003_vm15, %v537_v26, -9e+15  ;;  %1572 = vmatpush3.bf16.msra.mxu0 %v1777_v17  ;;  %1638 = vmatpush3.bf16.msra.mxu1 %v1777_v17  ;;  %v891_v23 = vunpack.c.l.bf16 %v2460_v47 }
 0x166   : > { %705 = vmax.xlane.f32.xlu1 %v704_v27  ;;  %v3098_v36 = vsel %vm3009_vm10, %v538_v16, -9e+15  ;;  %1573 = vmatprep.subr.bf16.mxu0 %v1778_v22  ;;  %v908_v61 = vunpack.c.h.bf16 %v2463_v48  ;;  %v907_v0 = vunpack.c.l.bf16 %v2463_v48  ;;  %v896_v27 = vunpack.c.h.bf16 %v2478_v53 }
 0x167   : > { %726 = vmax.xlane.f32.xlu0 %v725_v32  ;;  %v728_v45 = vmax.f32 %v3094_v14, %v3098_v36  ;;  %1631 = vmatprep.subr.bf16.mxu1 %v1778_v22  ;;  %v895_v26 = vunpack.c.l.bf16 %v2478_v53  ;;  %v3568_v22 = vld [vmem:[#allocation19_spill] sm:$0xff] }
 0x169   : > { %1574 = vmatpush3.bf16.msra.mxu0 %v1779_v56  ;;  %1639 = vmatpush3.bf16.msra.mxu1 %v1779_v56  ;;  %v912_v56 = vunpack.c.h.bf16 %v3568_v22 }
 0x16a   : > { %729 = vmax.xlane.f32.xlu1 %v728_v45  ;;  %1575 = vmatprep.subr.bf16.mxu0 %v1780_v25  ;;  %v3567_v45 = vld [vmem:[#allocation18_spill] sm:$0xff]  ;;  %p3585_p6 = scmp.ne.s32.totalorder %s3583_s29, 0 }
 0x16b   : > { %1632 = vmatprep.subr.bf16.mxu1 %v1780_v25 }
 0x16c   : > { %p2005_p12 = pnand %p2004_p7, %p3585_p6 }
 0x16d   : > { %1576 = vmatpush3.bf16.msra.mxu0 %v1781_v55  ;;  %1640 = vmatpush3.bf16.msra.mxu1 %v1781_v55  ;;  %v3569_v55 = vld [vmem:[#allocation25_spill] sm:$0xff] }
 0x16e   : > { %p2006_p3 = pneg %p2005_p12 }
 0x170   : > { %p2013_p11 = pnand %p2012_p9, %p2006_p3 }
 0x1c7   : > { %v685_v11 = vpop.xlane.xlu0 %684 }
 0x1c8   : > { %v731_v38 = vsub.f32 %v2638_v12, %v685_v11  ;;  %v732_v8 = vsub.f32 %v2642_v57, %v685_v11 }
 0x1ca   : > { %v763_v59 = vmul.f32 1.442695, %v731_v38  ;;  %v765_v10 = vmul.f32 1.442695, %v732_v8 }
 0x1cb   : > { %v709_v58 = vpop.xlane.xlu0 %708 }
 0x1cc   : > { %1782 = vpow2.f32 %v763_v59  ;;  %v747_v34 = vsub.f32 %v2669_v3, %v709_v58  ;;  %v748_v60 = vsub.f32 %v2673_v30, %v709_v58  ;;  %v894_v30 = vunpack.c.h.bf16 %v2466_v49  ;;  %v3570_v59 = vld [vmem:[#allocation20_spill] sm:$0xff] }
 0x1cd   : > { %1784 = vpow2.f32 %v765_v10  ;;  %v914_v10 = vunpack.c.h.bf16 %v3570_v59  ;;  %v911_v58 = vunpack.c.l.bf16 %v3568_v22 }
 0x1ce   : > { %v688_v37 = vpop.xlane.xlu1 %687  ;;  %v795_v24 = vmul.f32 1.442695, %v747_v34  ;;  %v797_v12 = vmul.f32 1.442695, %v748_v60  ;;  %v913_v34 = vunpack.c.l.bf16 %v3570_v59 }
 0x1cf   : > { %v733_v43 = vsub.f32 %v2691_v15, %v688_v37  ;;  %v734_v40 = vsub.f32 %v2707_v44, %v688_v37  ;;  %v893_v44 = vunpack.c.l.bf16 %v2466_v49 }
 0x1d0   : > { %1786 = vpow2.f32 %v795_v24  ;;  %v3572_v24 = vld [vmem:[#allocation27_spill] sm:$0xff] }
 0x1d1   : > { %v767_v28 = vmul.f32 1.442695, %v733_v43  ;;  %v769_v9 = vmul.f32 1.442695, %v734_v40  ;;  %v3571_v43 = vld [vmem:[#allocation26_spill] sm:$0xff] }
 0x1d2   : > { %v712_v57 = vpop.xlane.xlu1 %711 }
 0x1d3   : > { %1788 = vpow2.f32 %v767_v28  ;;  %v749_v3 = vsub.f32 %v2733_v18, %v712_v57  ;;  %v750_v33 = vsub.f32 %v2743_v35, %v712_v57  ;;  %v910_v18 = vunpack.c.h.bf16 %v2472_v50  ;;  %v3574_v57 = vld [vmem:[#allocation22_spill] sm:$0xff] }
 0x1d4   : > { %1790 = vpow2.f32 %v769_v9  ;;  %v909_v35 = vunpack.c.l.bf16 %v2472_v50 }
 0x1d5   : > { %v691_v15 = vpop.xlane.xlu0 %690  ;;  %v799_v51 = vmul.f32 1.442695, %v749_v3  ;;  %v801_v21 = vmul.f32 1.442695, %v750_v33  ;;  %1792 = vpow2.f32 %v797_v12 }
 0x1d6   : > { %v735_v39 = vsub.f32 %v2768_v4, %v691_v15  ;;  %v736_v41 = vsub.f32 %v2778_v19, %v691_v15  ;;  %v1783_v6 = vpop.eup %1782  ;;  %v898_v4 = vunpack.c.h.bf16 %v3567_v45  ;;  %v897_v19 = vunpack.c.l.bf16 %v3567_v45 }
 0x1d7   : > { %1794 = vpow2.f32 %v799_v51  ;;  %v1785_v16 = vpop.eup %1784  ;;  %v901_v15 = vunpack.c.l.bf16 %v3574_v57 }
 0x1d8   : > { %v771_v49 = vmul.f32 1.442695, %v735_v39  ;;  %v773_v32 = vmul.f32 1.442695, %v736_v41  ;;  %1796 = vpow2.f32 %v801_v21  ;;  %v827_v38 = vadd.f32 %v1785_v16, %v1783_v6 }
 0x1da   : > { %v694_v17 = vpop.xlane.xlu1 %693  ;;  %1798 = vpow2.f32 %v771_v49  ;;  %828 = vadd.xlane.f32.xlu0 %v827_v38  ;;  %v3136_v9 = vpop.eup %1786  ;;  %v923_v49 = vmul.f32 %v1783_v6, %v891_v23  ;;  %v3577_v23 = vld [vmem:[#allocation30_spill] sm:$0xff] }
 0x1db   : > { %v737_v25 = vsub.f32 %v2815_v2, %v694_v17  ;;  %v738_v11 = vsub.f32 %v3569_v55, %v694_v17  ;;  %1800 = vpow2.f32 %v773_v32  ;;  %v3573_v2 = vld [vmem:[#allocation21_spill] sm:$0xff]  ;;  %v3575_v17 = vld [vmem:[#allocation28_spill] sm:$0xff] }
 0x1dc   : > { %v715_v8 = vpop.xlane.xlu0 %714  ;;  %v899_v33 = vunpack.c.l.bf16 %v3573_v2  ;;  %v3576_v55 = vld [vmem:[#allocation29_spill] sm:$0xff] }
 0x1dd   : > { %v775_v37 = vmul.f32 1.442695, %v737_v25  ;;  %v777_v60 = vmul.f32 1.442695, %v738_v11  ;;  %v751_v40 = vsub.f32 %v3571_v43, %v715_v8  ;;  %v752_v28 = vsub.f32 %v3572_v24, %v715_v8  ;;  %v1789_v51 = vpop.eup %1788 }
 0x1de   : > { %v1791_v32 = vpop.eup %1790  ;;  %v925_v38 = vmul.f32 %v1789_v51, %v893_v44  ;;  %v924_v24 = vmul.f32 %v1785_v16, %v892_v13  ;;  %v939_v13 = vmul.f32 %v3136_v9, %v907_v0 }
 0x1df   : > { %1802 = vpow2.f32 %v775_v37  ;;  %v803_v21 = vmul.f32 1.442695, %v751_v40  ;;  %v805_v39 = vmul.f32 1.442695, %v752_v28  ;;  %v830_v43 = vadd.f32 %v1791_v32, %v1789_v51  ;;  %v3146_v12 = vpop.eup %1792  ;;  %v3578_v28 = vld [vmem:[#allocation31_spill] sm:$0xff] }
 0x1e0   : > { %v718_v41 = vpop.xlane.xlu1 %717  ;;  %1804 = vpow2.f32 %v777_v60  ;;  %v926_v3 = vmul.f32 %v1791_v32, %v894_v30 }
 0x1e1   : > { %v753_v25 = vsub.f32 %v3575_v17, %v718_v41  ;;  %v754_v11 = vsub.f32 %v3576_v55, %v718_v41  ;;  %1806 = vpow2.f32 %v803_v21  ;;  %v3149_v60 = vpop.eup %1794  ;;  %831 = vadd.xlane.f32.xlu1 %v830_v43  ;;  %v955_v21 = vpack.c.bf16 %v925_v38, %v923_v49  ;;  %v3579_v41 = vld [vmem:[#allocation23_spill] sm:$0xff] }
 0x1e2   : > { %1808 = vpow2.f32 %v805_v39  ;;  %v956_v44 = vpack.c.bf16 %v926_v3, %v924_v24  ;;  %v916_v51 = vunpack.c.h.bf16 %v3579_v41  ;;  %v3153_v55 = vpop.eup %1796  ;;  %v941_v30 = vmul.f32 %v3149_v60, %v909_v35 }
 0x1e3   : > { %v697_v8 = vpop.xlane.xlu0 %696  ;;  %v807_v37 = vmul.f32 1.442695, %v753_v25  ;;  %v809_v40 = vmul.f32 1.442695, %v754_v11  ;;  %v940_v3 = vmul.f32 %v3146_v12, %v908_v61  ;;  %v942_v49 = vmul.f32 %v3153_v55, %v910_v18 }
 0x1e4   : > { %v739_v6 = vsub.f32 %v3577_v23, %v697_v8  ;;  %v740_v17 = vsub.f32 %v3578_v28, %v697_v8  ;;  %v1799_v16 = vpop.eup %1798  ;;  %1131 = vmatprep.mubr.bf16.mxu0 %v956_v44  ;;  %v963_v38 = vpack.c.bf16 %v941_v30, %v939_v13  ;;  %v915_v18 = vunpack.c.l.bf16 %v3579_v41 }
 0x1e5   : > { %1810 = vpow2.f32 %v807_v37  ;;  %v1801_v25 = vpop.eup %1800  ;;  %1132 = vmatmul.mubr.bf16.vlgmr.msra.gmra.mrb[0].mxu0 %v955_v21  ;;  %v964_v50 = vpack.c.bf16 %v942_v49, %v940_v3  ;;  %v927_v30 = vmul.f32 %v1799_v16, %v895_v26 }
 0x1e6   : > { %v779_v47 = vmul.f32 1.442695, %v739_v6  ;;  %1812 = vpow2.f32 %v809_v40  ;;  %v781_v39 = vmul.f32 1.442695, %v740_v17  ;;  %v833_v43 = vadd.f32 %v1801_v25, %v1799_v16  ;;  %v3580_v6 = vld [vmem:[#allocation24_spill] sm:$0xff] }
 0x1e7   : > { %v918_v28 = vunpack.c.h.bf16 %v3580_v6  ;;  %1163 = vmatprep.mubr.bf16.mxu1 %v964_v50 }
 0x1e8   : > { %1814 = vpow2.f32 %v779_v47  ;;  %834 = vadd.xlane.f32.xlu0 %v833_v43  ;;  %1164 = vmatmul.mubr.bf16.vlgmr.msra.gmra.mrb[0].mxu1 %v963_v38 }
 0x1e9   : > { %1816 = vpow2.f32 %v781_v39  ;;  %v1803_v37 = vpop.eup %1802 }
 0x1ea   : > { %v700_v32 = vpop.xlane.xlu1 %699  ;;  %v1805_v17 = vpop.eup %1804  ;;  %v929_v44 = vmul.f32 %v1803_v37, %v897_v19 }
 0x1eb   : > { %v741_v0 = vsub.f32 %v2988_v5, %v700_v32  ;;  %v742_v11 = vsub.f32 %v2994_v46, %v700_v32  ;;  %v721_v35 = vpop.xlane.xlu0 %720  ;;  %v928_v46 = vmul.f32 %v1801_v25, %v896_v27  ;;  %v3179_v21 = vpop.eup %1806  ;;  %v836_v13 = vadd.f32 %v1805_v17, %v1803_v37 }
 0x1ec   : > { %v755_v8 = vsub.f32 %v3017_v1, %v721_v35  ;;  %v756_v48 = vsub.f32 %v3021_v62, %v721_v35  ;;  %v930_v27 = vmul.f32 %v1805_v17, %v898_v4  ;;  %v3185_v39 = vpop.eup %1808  ;;  %v957_v25 = vpack.c.bf16 %v929_v44, %v927_v30 }
 0x1ed   : > { %v783_v61 = vmul.f32 1.442695, %v741_v0  ;;  %v785_v24 = vmul.f32 1.442695, %v742_v11  ;;  %837 = vadd.xlane.f32.xlu1 %v836_v13  ;;  %v943_v11 = vmul.f32 %v3179_v21, %v911_v58  ;;  %v3582_v44 = vunpack.c.h.bf16 %v3574_v57  ;;  %v1912_v57 = vld [vmem:[%s2435_s11 + $0x38] sm:$0xff] }
 0x1ee   : > { %v811_v40 = vmul.f32 1.442695, %v755_v8  ;;  %v813_v23 = vmul.f32 1.442695, %v756_v48  ;;  %v958_v49 = vpack.c.bf16 %v930_v27, %v928_v46 }
 0x1ef   : > { %v724_v5 = vpop.xlane.xlu1 %723  ;;  %1818 = vpow2.f32 %v783_v61  ;;  %v3189_v0 = vpop.eup %1810 }
 0x1f0   : > { %v757_v1 = vsub.f32 %v3037_v63, %v724_v5  ;;  %v758_v62 = vsub.f32 %v3041_v20, %v724_v5  ;;  %1820 = vpow2.f32 %v785_v24  ;;  %v703_v47 = vpop.xlane.xlu0 %702  ;;  %v3193_v4 = vpop.eup %1812  ;;  %1139 = vmatprep.mubr.bf16.mxu0 %v958_v49  ;;  %v945_v22 = vmul.f32 %v3189_v0, %v913_v34 }
 0x1f1   : > { %1822 = vpow2.f32 %v811_v40  ;;  %v743_v32 = vsub.f32 %v3052_v54, %v703_v47  ;;  %v744_v19 = vsub.f32 %v3058_v42, %v703_v47  ;;  %v944_v42 = vmul.f32 %v3185_v39, %v912_v56  ;;  %1140 = vmatmul.mubr.bf16.gmra.mrb[4].mxu0 %v957_v25 }
 0x1f2   : > { %v815_v63 = vmul.f32 1.442695, %v757_v1  ;;  %v817_v20 = vmul.f32 1.442695, %v758_v62  ;;  %1824 = vpow2.f32 %v813_v23  ;;  %v1815_v35 = vpop.eup %1814  ;;  %v946_v56 = vmul.f32 %v3193_v4, %v914_v10 }
 0x1f3   : > { %v706_v3 = vpop.xlane.xlu1 %705  ;;  %v787_v45 = vmul.f32 1.442695, %v743_v32  ;;  %v789_v16 = vmul.f32 1.442695, %v744_v19  ;;  %v1817_v8 = vpop.eup %1816  ;;  %v965_v10 = vpack.c.bf16 %v945_v22, %v943_v11  ;;  %v931_v59 = vmul.f32 %v1815_v35, %v899_v33  ;;  %v1913_v11 = vld [vmem:[%s2435_s11 + $0x70] sm:$0xff] }
 0x1f4   : > { %1826 = vpow2.f32 %v815_v63  ;;  %v745_v53 = vsub.f32 %v3069_v31, %v706_v3  ;;  %v746_v26 = vsub.f32 %v3074_v29, %v706_v3  ;;  %v727_v54 = vpop.xlane.xlu0 %726  ;;  %v839_v50 = vadd.f32 %v1817_v8, %v1815_v35 }
 0x1f5   : > { %1828 = vpow2.f32 %v817_v20  ;;  %v759_v29 = vsub.f32 %v3082_v52, %v727_v54  ;;  %v760_v48 = vsub.f32 %v3086_v7, %v727_v54  ;;  %v966_v7 = vpack.c.bf16 %v946_v56, %v944_v42 }
 0x1f6   : > { %1830 = vpow2.f32 %v787_v45  ;;  %v791_v38 = vmul.f32 1.442695, %v745_v53  ;;  %v793_v31 = vmul.f32 1.442695, %v746_v26  ;;  %840 = vadd.xlane.f32.xlu0 %v839_v50  ;;  %v3581_v1 = vunpack.c.h.bf16 %v3573_v2  ;;  %v1911_v2 = vld [vmem:[%s2435_s11 + $0x30] sm:$0xff] }
 0x1f7   : > { %1832 = vpow2.f32 %v789_v16  ;;  %v730_v43 = vpop.xlane.xlu1 %729  ;;  %v819_v58 = vmul.f32 1.442695, %v759_v29  ;;  %v821_v24 = vmul.f32 1.442695, %v760_v48  ;;  %1171 = vmatprep.mubr.bf16.mxu1 %v966_v7  ;;  %v903_v32 = vunpack.c.l.bf16 %v1911_v2 }
 0x1f8   : > { %1834 = vpow2.f32 %v791_v38  ;;  %v761_v61 = vsub.f32 %v3094_v14, %v730_v43  ;;  %v762_v52 = vsub.f32 %v3098_v36, %v730_v43  ;;  %v1910_v36 = vld [vmem:[%s2435_s11 + $0x68] sm:$0xff]  ;;  %1172 = vmatmul.mubr.bf16.gmra.mrb[4].mxu1 %v965_v10  ;;  %v932_v62 = vmul.f32 %v1817_v8, %v3581_v1  ;;  %v1914_v8 = vld [vmem:[%s2435_s11 + $0x78] sm:$0xff]  ;;  %s3584_s11 = sld [smem:[#allocation34_spill]] }
 0x1f9   : > { %1836 = vpow2.f32 %v793_v31  ;;  %v1819_v37 = vpop.eup %1818  ;;  %v917_v34 = vunpack.c.l.bf16 %v1910_v36  ;;  %v905_v19 = vunpack.c.l.bf16 %v1912_v57  ;;  %v904_v45 = vunpack.c.h.bf16 %v1911_v2 }
 0x1fa   : > { %1838 = vpow2.f32 %v819_v58  ;;  %v823_v40 = vmul.f32 1.442695, %v761_v61  ;;  %v825_v23 = vmul.f32 1.442695, %v762_v52  ;;  %v1821_v5 = vpop.eup %1820  ;;  %v933_v14 = vmul.f32 %v1819_v37, %v901_v15 }
 0x1fb   : > { %1840 = vpow2.f32 %v821_v24  ;;  %v3216_v46 = vpop.eup %1822  ;;  %v842_v17 = vadd.f32 %v1821_v5, %v1819_v37  ;;  %v934_v47 = vmul.f32 %v1821_v5, %v3582_v44  ;;  %v906_v53 = vunpack.c.h.bf16 %v1912_v57 }
 0x1fc   : > { %1842 = vpow2.f32 %v823_v40  ;;  %v3222_v13 = vpop.eup %1824  ;;  %v959_v33 = vpack.c.bf16 %v933_v14, %v931_v59  ;;  %v947_v63 = vmul.f32 %v3216_v46, %v915_v18  ;;  %v920_v35 = vunpack.c.h.bf16 %v1913_v11 }
 0x1fd   : > { %1844 = vpow2.f32 %v825_v23  ;;  %843 = vadd.xlane.f32.xlu1 %v842_v17  ;;  %v960_v27 = vpack.c.bf16 %v934_v47, %v932_v62  ;;  %v948_v49 = vmul.f32 %v3222_v13, %v916_v51  ;;  %v919_v41 = vunpack.c.l.bf16 %v1913_v11 }
 0x1fe   : > { %v3224_v15 = vpop.eup %1826  ;;  %v921_v51 = vunpack.c.l.bf16 %v1914_v8  ;;  %v922_v56 = vunpack.c.h.bf16 %v1914_v8  ;;  %v851_v52 = vadd.f32 %v3146_v12, %v3136_v9  ;;  %v854_v40 = vadd.f32 %v3153_v55, %v3149_v60  ;;  %s3332_s30 = scalar_lea.hbm %s3584_s11, %s1517_s21 }
 0x1ff   : > { %v1829_v30 = vpop.eup %1828  ;;  %v949_v20 = vmul.f32 %v3224_v15, %v917_v34  ;;  %1147 = vmatprep.mubr.bf16.mxu0 %v960_v27  ;;  %v857_v59 = vadd.f32 %v3185_v39, %v3179_v21  ;;  %v860_v9 = vadd.f32 %v3193_v4, %v3189_v0  ;;  %v863_v12 = vadd.f32 %v3222_v13, %v3216_v46 }
 0x200   : > { %v1831_v3 = vpop.eup %1830  ;;  %v950_v25 = vmul.f32 %v1829_v30, %v918_v28  ;;  %1148 = vmatmul.mubr.bf16.gmra.mrb[8].mxu0 %v959_v33  ;;  %v866_v60 = vadd.f32 %v1829_v30, %v3224_v15 }
 0x201   : > { %v1833_v18 = vpop.eup %1832  ;;  %v967_v26 = vpack.c.bf16 %v949_v20, %v947_v63  ;;  %v935_v31 = vmul.f32 %v1831_v3, %v903_v32 }
 0x202   : > { %v1835_v16 = vpop.eup %1834  ;;  %v845_v54 = vadd.f32 %v1833_v18, %v1831_v3  ;;  %v968_v42 = vpack.c.bf16 %v950_v25, %v948_v49  ;;  %v936_v28 = vmul.f32 %v1833_v18, %v904_v45 }
 0x203   : > { %v1837_v38 = vpop.eup %1836  ;;  %v937_v29 = vmul.f32 %v1835_v16, %v905_v19 }
 0x204   : > { %v1839_v48 = vpop.eup %1838  ;;  %846 = vadd.xlane.f32.xlu0 %v845_v54  ;;  %1179 = vmatprep.mubr.bf16.mxu1 %v968_v42  ;;  %v848_v6 = vadd.f32 %v1837_v38, %v1835_v16  ;;  %v938_v43 = vmul.f32 %v1837_v38, %v906_v53 }
 0x205   : > { %v1841_v22 = vpop.eup %1840  ;;  %1180 = vmatmul.mubr.bf16.gmra.mrb[8].mxu1 %v967_v26  ;;  %v961_v58 = vpack.c.bf16 %v937_v29, %v935_v31  ;;  %v951_v7 = vmul.f32 %v1839_v48, %v919_v41 }
 0x206   : > { %v1843_v61 = vpop.eup %1842  ;;  %849 = vadd.xlane.f32.xlu1 %v848_v6  ;;  %v962_v24 = vpack.c.bf16 %v938_v43, %v936_v28  ;;  %v952_v23 = vmul.f32 %v1841_v22, %v920_v35  ;;  %v869_v55 = vadd.f32 %v1841_v22, %v1839_v48 }
 0x207   : > { %v1845_v50 = vpop.eup %1844  ;;  %v953_v37 = vmul.f32 %v1843_v61, %v921_v51 }
 0x208   : > { %852 = vadd.xlane.f32.xlu0 %v851_v52  ;;  %1155 = vmatprep.mubr.bf16.mxu0 %v962_v24  ;;  %v954_v10 = vmul.f32 %v1845_v50, %v922_v56  ;;  %v872_v36 = vadd.f32 %v1845_v50, %v1843_v61 }
 0x209   : > { %1156 = vmatmul.mubr.bf16.gmra.mrb[12].mxu0 %v961_v58  ;;  %v969_v5 = vpack.c.bf16 %v953_v37, %v951_v7 }
 0x20a   : > { %855 = vadd.xlane.f32.xlu1 %v854_v40  ;;  %v970_v14 = vpack.c.bf16 %v954_v10, %v952_v23 }
 0x20c   : > { %858 = vadd.xlane.f32.xlu0 %v857_v59  ;;  %1187 = vmatprep.mubr.bf16.mxu1 %v970_v14 }
 0x20d   : > { %1188 = vmatmul.mubr.bf16.gmra.mrb[12].mxu1 %v969_v5 }
 0x20e   : > { %861 = vadd.xlane.f32.xlu1 %v860_v9 }
 0x210   : > { %864 = vadd.xlane.f32.xlu0 %v863_v12 }
 0x212   : > { %867 = vadd.xlane.f32.xlu1 %v866_v60 }
 0x214   : > { %870 = vadd.xlane.f32.xlu0 %v869_v55 }
 0x216   : > { %873 = vadd.xlane.f32.xlu1 %v872_v36 }
 0x267   : > { %v829_v21 = vpop.xlane.xlu0 %828 }
 0x268   : > { %1846 = vrcp.f32 %v829_v21 }
 0x26e   : > { %v832_v39 = vpop.xlane.xlu1 %831 }
 0x26f   : > { %1848 = vrcp.f32 %v832_v39 }
 0x272   : > { %v1847_v27 = vpop.eup %1846 }
 0x275   : > { %v835_v34 = vpop.xlane.xlu0 %834 }
 0x279   : > { %v1849_v2 = vpop.eup %1848 }
 0x27a   : > { %v838_v17 = vpop.xlane.xlu1 %837 }
 0x283   : > { %v841_v1 = vpop.xlane.xlu0 %840 }
 0x28a   : > { %v844_v62 = vpop.xlane.xlu1 %843 }
 0x291   : > { %v3250_v0 = vpop.xlane.xlu0 %846 }
 0x293   : > { %v3252_v4 = vpop.xlane.xlu1 %849 }
 0x295   : > { %v853_v46 = vpop.xlane.xlu0 %852 }
 0x296   : > { %1850 = vrcp.f32 %v853_v46 }
 0x297   : > { %v856_v44 = vpop.xlane.xlu1 %855 }
 0x298   : > { %1852 = vrcp.f32 %v856_v44 }
 0x299   : > { %1854 = vrcp.f32 %v835_v34  ;;  %v859_v57 = vpop.xlane.xlu0 %858 }
 0x29a   : > { %1856 = vrcp.f32 %v838_v17 }
 0x29b   : > { %v862_v18 = vpop.xlane.xlu1 %861 }
 0x29d   : > { %v865_v22 = vpop.xlane.xlu0 %864 }
 0x29f   : > { %v868_v7 = vpop.xlane.xlu1 %867 }
 0x2a0   : > { %v1851_v53 = vpop.eup %1850 }
 0x2a1   : > { %v871_v39 = vpop.xlane.xlu0 %870 }
 0x2a2   : > { %v1853_v11 = vpop.eup %1852 }
 0x2a3   : > { %v1855_v51 = vpop.eup %1854 }
 0x2a4   : > { %v1857_v56 = vpop.eup %1856 }
 0x2b8   : > { %v1577_v47 = vpop.f32.mrb[0].mxu0 }
 0x2b9   : > { %v1578_v13 = vpop.f32.mrb[1].mxu0 }
 0x2ba   : > { %v1579_v33 = vadd.f32 %v1578_v13, %v1577_v47  ;;  %v1580_v15 = vpop.f32.mrb[2].mxu0 }
 0x2bb   : > { %v1581_v30 = vpop.f32.mrb[3].mxu0  ;;  %v1601_v32 = vpop.f32.mrb[0].mxu1 }
 0x2bc   : > { %v1196_v63 = vmul.f32 %v1847_v27, %v1579_v33  ;;  %v1582_v20 = vadd.f32 %v1581_v30, %v1580_v15  ;;  %v1602_v49 = vpop.f32.mrb[1].mxu1 }
 0x2bd   : > { %v1603_v25 = vadd.f32 %v1602_v49, %v1601_v32  ;;  %v1604_v45 = vpop.f32.mrb[2].mxu1 }
 0x2be   : > { %v1228_v19 = vmul.f32 1.442695, %v1196_v63  ;;  %v3254_v3 = vmul.f32 %v1849_v2, %v1582_v20  ;;  %v1605_v16 = vpop.f32.mrb[3].mxu1  ;;  %vm1212_vm0 = vcmp.gt.f32.partialorder %v1196_v63, 0.0 }
 0x2bf   : > { %v3257_v54 = vmul.f32 %v1851_v53, %v1603_v25  ;;  %v1606_v42 = vadd.f32 %v1605_v16, %v1604_v45 }
 0x2c0   : > { %1858 = vpow2.f32 %v1228_v19  ;;  %v1230_v26 = vmul.f32 1.442695, %v3254_v3  ;;  %vm1213_vm4 = vcmp.gt.f32.partialorder %v3254_v3, 0.0  ;;  %v874_v19 = vpop.xlane.xlu1 %873 }
 0x2c1   : > { %1860 = vrcp.f32 %v859_v57  ;;  %v1244_v38 = vmul.f32 1.442695, %v3257_v54  ;;  %v3260_v31 = vmul.f32 %v1853_v11, %v1606_v42  ;;  %vm1220_vm5 = vcmp.gt.f32.partialorder %v3257_v54, 0.0 }
 0x2c2   : > { %1862 = vpow2.f32 %v1230_v26 }
 0x2c3   : > { %1864 = vrcp.f32 %v862_v18  ;;  %v1246_v48 = vmul.f32 1.442695, %v3260_v31  ;;  %vm1221_vm13 = vcmp.gt.f32.partialorder %v3260_v31, 0.0 }
 0x2c4   : > { %v1583_v35 = vpop.f32.mrb[4].mxu0  ;;  %1866 = vpow2.f32 %v1244_v38 }
 0x2c5   : > { %v1584_v29 = vpop.f32.mrb[5].mxu0  ;;  %1868 = vrcp.f32 %v841_v1 }
 0x2c6   : > { %v1585_v41 = vadd.f32 %v1584_v29, %v1583_v35  ;;  %v1586_v8 = vpop.f32.mrb[6].mxu0  ;;  %1870 = vpow2.f32 %v1246_v48 }
 0x2c7   : > { %v1587_v6 = vpop.f32.mrb[7].mxu0  ;;  %1872 = vrcp.f32 %v844_v62 }
 0x2c8   : > { %v3263_v28 = vmul.f32 %v1855_v51, %v1585_v41  ;;  %v1588_v43 = vadd.f32 %v1587_v6, %v1586_v8 }
 0x2ca   : > { %v1232_v58 = vmul.f32 1.442695, %v3263_v28  ;;  %v3266_v61 = vmul.f32 %v1857_v56, %v1588_v43  ;;  %v1859_v50 = vpop.eup %1858  ;;  %vm1214_vm15 = vcmp.gt.f32.partialorder %v3263_v28, 0.0 }
 0x2cb   : > { %v1607_v52 = vpop.f32.mrb[4].mxu1  ;;  %v1861_v10 = vpop.eup %1860  ;;  %v1498_v5 = vadd.f32 -1.0, %v1859_v50 }
 0x2cc   : > { %v1608_v24 = vpop.f32.mrb[5].mxu1  ;;  %1874 = vpow2.f32 %v1232_v58  ;;  %v1234_v37 = vmul.f32 1.442695, %v3266_v61  ;;  %v1863_v14 = vpop.eup %1862  ;;  %vm1215_vm10 = vcmp.gt.f32.partialorder %v3266_v61, 0.0 }
 0x2cd   : > { %v1609_v40 = vadd.f32 %v1608_v24, %v1607_v52  ;;  %v1610_v23 = vpop.f32.mrb[6].mxu1  ;;  %1876 = vrcp.f32 %v865_v22  ;;  %v1865_v60 = vpop.eup %1864  ;;  %v1276_v55 = vsel %vm1212_vm0, %v1196_v63, %v1498_v5  ;;  %v1499_v36 = vadd.f32 -1.0, %v1863_v14 }
 0x2ce   : > { %v1611_v59 = vpop.f32.mrb[7].mxu1  ;;  %1878 = vpow2.f32 %v1234_v37  ;;  %1292 = vst [vmem:[%s3273_s4] sm:$0xff] %v1276_v55  ;;  %v1867_v62 = vpop.eup %1866 }
 0x2cf   : > { %v3269_v9 = vmul.f32 %v1861_v10, %v1609_v40  ;;  %v1612_v12 = vadd.f32 %v1611_v59, %v1610_v23  ;;  %1880 = vrcp.f32 %v868_v7  ;;  %v1277_v46 = vsel %vm1213_vm4, %v3254_v3, %v1499_v36  ;;  %v1869_v47 = vpop.eup %1868 }
 0x2d0   : > { %1882 = vrcp.f32 %v3250_v0  ;;  %1293 = vst [vmem:[%s3273_s4 + $0x8] sm:$0xff] %v1277_v46  ;;  %v1506_v13 = vadd.f32 -1.0, %v1867_v62  ;;  %v1871_v27 = vpop.eup %1870 }
 0x2d1   : > { %v1248_v34 = vmul.f32 1.442695, %v3269_v9  ;;  %v3278_v17 = vmul.f32 %v1865_v60, %v1612_v12  ;;  %1884 = vrcp.f32 %v3252_v4  ;;  %v1873_v20 = vpop.eup %1872  ;;  %v1507_v32 = vadd.f32 -1.0, %v1871_v27 }
 0x2d2   : > { %v1284_v2 = vsel %vm1220_vm5, %v3257_v54, %v1506_v13  ;;  %vm1222_vm1 = vcmp.gt.f32.partialorder %v3269_v9, 0.0 }
 0x2d3   : > { %v1589_v21 = vpop.f32.mrb[8].mxu0  ;;  %1886 = vpow2.f32 %v1248_v34  ;;  %v1250_v33 = vmul.f32 1.442695, %v3278_v17  ;;  %1300 = vst [vmem:[%s3273_s4 + $0x40] sm:$0xff] %v1284_v2  ;;  %v1285_v18 = vsel %vm1221_vm13, %v3260_v31, %v1507_v32  ;;  %vm1223_vm12 = vcmp.gt.f32.partialorder %v3278_v17, 0.0 }
 0x2d4   : > { %v1590_v1 = vpop.f32.mrb[9].mxu0  ;;  %1888 = vrcp.f32 %v871_v39  ;;  %1301 = vst [vmem:[%s3273_s4 + $0x48] sm:$0xff] %v1285_v18 }
 0x2d5   : > { %v1591_v44 = vadd.f32 %v1590_v1, %v1589_v21  ;;  %v1592_v0 = vpop.f32.mrb[10].mxu0  ;;  %1890 = vpow2.f32 %v1250_v33 }
 0x2d6   : > { %v1593_v15 = vpop.f32.mrb[11].mxu0  ;;  %v1875_v53 = vpop.eup %1874 }
 0x2d7   : > { %v3285_v30 = vmul.f32 %v1869_v47, %v1591_v44  ;;  %v1594_v63 = vadd.f32 %v1593_v15, %v1592_v0  ;;  %v1877_v16 = vpop.eup %1876  ;;  %v1500_v54 = vadd.f32 -1.0, %v1875_v53 }
 0x2d8   : > { %v1613_v4 = vpop.f32.mrb[8].mxu1  ;;  %v1879_v35 = vpop.eup %1878 }
 0x2d9   : > { %v1614_v57 = vpop.f32.mrb[9].mxu1  ;;  %v1236_v3 = vmul.f32 1.442695, %v3285_v30  ;;  %v3291_v49 = vmul.f32 %v1873_v20, %v1594_v63  ;;  %v1881_v8 = vpop.eup %1880  ;;  %v1278_v31 = vsel %vm1214_vm15, %v3263_v28, %v1500_v54  ;;  %v1501_v51 = vadd.f32 -1.0, %v1879_v35 }
 0x2da   : > { %v1615_v25 = vadd.f32 %v1614_v57, %v1613_v4  ;;  %v1616_v45 = vpop.f32.mrb[10].mxu1  ;;  %v1883_v43 = vpop.eup %1882  ;;  %1294 = vst [vmem:[%s3273_s4 + $0x10] sm:$0xff] %v1278_v31  ;;  %vm1216_vm2 = vcmp.gt.f32.partialorder %v3285_v30, 0.0 }
 0x2db   : > { %v1617_v26 = vpop.f32.mrb[11].mxu1  ;;  %1892 = vpow2.f32 %v1236_v3  ;;  %v1238_v42 = vmul.f32 1.442695, %v3291_v49  ;;  %v1885_v52 = vpop.eup %1884  ;;  %v1279_v24 = vsel %vm1215_vm10, %v3266_v61, %v1501_v51  ;;  %vm1217_vm3 = vcmp.gt.f32.partialorder %v3291_v49, 0.0 }
 0x2dc   : > { %v1595_v11 = vpop.f32.mrb[12].mxu0  ;;  %1894 = vrcp.f32 %v874_v19  ;;  %v3297_v38 = vmul.f32 %v1877_v16, %v1615_v25  ;;  %v1618_v29 = vadd.f32 %v1617_v26, %v1616_v45  ;;  %1295 = vst [vmem:[%s3273_s4 + $0x18] sm:$0xff] %v1279_v24 }
 0x2dd   : > { %v1596_v41 = vpop.f32.mrb[13].mxu0  ;;  %1896 = vpow2.f32 %v1238_v42  ;;  %v1887_v28 = vpop.eup %1886 }
 0x2de   : > { %v1597_v48 = vadd.f32 %v1596_v41, %v1595_v11  ;;  %v1598_v6 = vpop.f32.mrb[14].mxu0  ;;  %v1252_v56 = vmul.f32 1.442695, %v3297_v38  ;;  %v1209_v22 = vmul.f32 %v1881_v8, %v1618_v29  ;;  %v1889_v10 = vpop.eup %1888  ;;  %v1508_v5 = vadd.f32 -1.0, %v1887_v28 }
 0x2df   : > { %v1599_v58 = vpop.f32.mrb[15].mxu0  ;;  %v1891_v60 = vpop.eup %1890  ;;  %vm1224_vm7 = vcmp.gt.f32.partialorder %v3297_v38, 0.0 }
 0x2e0   : > { %v1202_v50 = vmul.f32 %v1883_v43, %v1597_v48  ;;  %v1600_v7 = vadd.f32 %v1599_v58, %v1598_v6  ;;  %v1619_v37 = vpop.f32.mrb[12].mxu1  ;;  %1898 = vpow2.f32 %v1252_v56  ;;  %v1254_v40 = vmul.f32 1.442695, %v1209_v22 }
 0x2e1   : > { %v1620_v23 = vpop.f32.mrb[13].mxu1  ;;  %v1286_v36 = vsel %vm1222_vm1, %v3269_v9, %v1508_v5  ;;  %v1509_v21 = vadd.f32 -1.0, %v1891_v60  ;;  %vm1225_vm11 = vcmp.gt.f32.partialorder %v1209_v22, 0.0 }
 0x2e2   : > { %v1240_v59 = vmul.f32 1.442695, %v1202_v50  ;;  %v1203_v14 = vmul.f32 %v1885_v52, %v1600_v7  ;;  %v1622_v12 = vpop.f32.mrb[14].mxu1  ;;  %1900 = vpow2.f32 %v1254_v40  ;;  %v1621_v61 = vadd.f32 %v1620_v23, %v1619_v37  ;;  %1302 = vst [vmem:[%s3273_s4 + $0x50] sm:$0xff] %v1286_v36 }
 0x2e3   : > { %v1623_v55 = vpop.f32.mrb[15].mxu1  ;;  %v1287_v46 = vsel %vm1223_vm12, %v3278_v17, %v1509_v21  ;;  %vm1218_vm6 = vcmp.gt.f32.partialorder %v1202_v50, 0.0 }
 0x2e4   : > { %1902 = vpow2.f32 %v1240_v59  ;;  %v1242_v39 = vmul.f32 1.442695, %v1203_v14  ;;  %v1210_v34 = vmul.f32 %v1889_v10, %v1621_v61  ;;  %v1624_v1 = vadd.f32 %v1623_v55, %v1622_v12  ;;  %1303 = vst [vmem:[%s3273_s4 + $0x58] sm:$0xff] %v1287_v46 }
 0x2e5   : > { %v1893_v62 = vpop.eup %1892  ;;  %vm1219_vm14 = vcmp.gt.f32.partialorder %v1203_v14, 0.0 }
 0x2e6   : > { %v1895_v44 = vpop.eup %1894  ;;  %v1502_v0 = vadd.f32 -1.0, %v1893_v62  ;;  %1904 = vpow2.f32 %v1242_v39  ;;  %v1256_v47 = vmul.f32 1.442695, %v1210_v34  ;;  %vm1226_vm8 = vcmp.gt.f32.partialorder %v1210_v34, 0.0 }
 0x2e7   : > { %v1897_v13 = vpop.eup %1896  ;;  %v1211_v9 = vmul.f32 %v1895_v44, %v1624_v1 }
 0x2e8   : > { %v1280_v33 = vsel %vm1216_vm2, %v3285_v30, %v1502_v0  ;;  %v1503_v15 = vadd.f32 -1.0, %v1897_v13  ;;  %1906 = vpow2.f32 %v1256_v47 }
 0x2e9   : > { %1296 = vst [vmem:[%s3273_s4 + $0x20] sm:$0xff] %v1280_v33  ;;  %v1258_v17 = vmul.f32 1.442695, %v1211_v9  ;;  %vm1227_vm9 = vcmp.gt.f32.partialorder %v1211_v9, 0.0 }
 0x2ea   : > { %v1899_v27 = vpop.eup %1898  ;;  %v1281_v63 = vsel %vm1217_vm3, %v3291_v49, %v1503_v15 }
 0x2eb   : > { %1297 = vst [vmem:[%s3273_s4 + $0x28] sm:$0xff] %v1281_v63  ;;  %v1510_v4 = vadd.f32 -1.0, %v1899_v27  ;;  %1908 = vpow2.f32 %v1258_v17 }
 0x2ec   : > { %v1901_v20 = vpop.eup %1900 }
 0x2ed   : > { %v1288_v2 = vsel %vm1224_vm7, %v3297_v38, %v1510_v4  ;;  %v1511_v32 = vadd.f32 -1.0, %v1901_v20 }
 0x2ee   : > { %v1903_v30 = vpop.eup %1902  ;;  %1304 = vst [vmem:[%s3273_s4 + $0x60] sm:$0xff] %v1288_v2 }
 0x2ef   : > { %v1504_v57 = vadd.f32 -1.0, %v1903_v30  ;;  %v1289_v19 = vsel %vm1225_vm11, %v1209_v22, %v1511_v32 }
 0x2f0   : > { %v1905_v3 = vpop.eup %1904  ;;  %1305 = vst [vmem:[%s3273_s4 + $0x68] sm:$0xff] %v1289_v19 }
 0x2f1   : > { %v1282_v49 = vsel %vm1218_vm6, %v1202_v50, %v1504_v57  ;;  %v1505_v25 = vadd.f32 -1.0, %v1905_v3 }
 0x2f2   : > { %1298 = vst [vmem:[%s3273_s4 + $0x30] sm:$0xff] %v1282_v49  ;;  %v1907_v45 = vpop.eup %1906 }
 0x2f3   : > { %v1283_v53 = vsel %vm1219_vm14, %v1203_v14, %v1505_v25  ;;  %v1512_v18 = vadd.f32 -1.0, %v1907_v45 }
 0x2f4   : > { %1299 = vst [vmem:[%s3273_s4 + $0x38] sm:$0xff] %v1283_v53 }
 0x2f5   : > { %v1909_v26 = vpop.eup %1908  ;;  %v1290_v16 = vsel %vm1226_vm8, %v1210_v34, %v1512_v18 }
 0x2f6   : > { %1306 = vst [vmem:[%s3273_s4 + $0x70] sm:$0xff] %v1290_v16  ;;  %v1513_v54 = vadd.f32 -1.0, %v1909_v26 }
 0x2f8   : > { %v1291_v42 = vsel %vm1227_vm9, %v1211_v9, %v1513_v54 }
 0x2f9   : > { %1307 = vst [vmem:[%s3273_s4 + $0x78] sm:$0xff] %v1291_v42 }
 0x2fa   : > { %2016 = shalt.err (!%p2013_p11)
}
 0x2fb   : > { %s2017_s0 = scalar_lea.hbm %s3332_s30, 2048  ;;  %s2021_s10 = scalar_lea.hbm %s3584_s11, 8192 }
 0x2fc   : > { %p2018_p0 = scmp.ne.s32.totalorder %s3332_s30, %s2017_s0  ;;  %p2022_p8 = scmp.lt.u32.totalorder %s3332_s30, %s3584_s11 }
 0x2fd   : > { %p2023_p2 = scmp.lt.u32.totalorder %s2021_s10, %s2017_s0  ;;  %p2025_p7 = scmp.lt.u32.totalorder %s2017_s0, %s3332_s30 }
 0x2fe   : > { %p2019_p13 = pnand %p2018_p0, %p3585_p6 }
 0x2ff   : > { %p2024_p4 = por %p2023_p2, %p2022_p8 }
 0x300   : > { %p2020_p1 = pneg %p2019_p13 }
 0x301   : > { %p2026_p12 = por %p2025_p7, %p2024_p4 }
 0x303   : > { %p2027_p3 = pnand %p2026_p12, %p2020_p1 }
 0x305   : > { %2030 = shalt.err (!%p2027_p3)
}
 0x306   : > { %s2144_s5 = smov 128   ;;  %s2145_s7 = smov 8  }
 0x307   : > { %1649 = dma.vmem_to_hbm [thread:$0]  (%p3585_p6), %s3327_s26, 2048, %s3332_s30, %s3337_s28, %s2144_s5, %s2144_s5, %s2145_s7  }
 0x308 PF: > { %s3586_s21 = sld [smem:[#allocation14_spill]]  ;;  %s3587_s22 = sld [smem:[#allocation13_spill]] }
 0x309   : > { %s3588_s12 = sld [smem:[#allocation16_spill]] }
 0x30e   : > { %p1669_p10 = scmp.ge.s32.totalorder %s3586_s21, 2  ;;  %s1339_s14 = sand.u32 1, %s3587_s22  }
 0x30f   : > { %p3589_p5 = scmp.ne.s32.totalorder %s3588_s12, 0  ;;  %s1340_s13 = scalar_lea.sflag [#allocation4], %s1339_s14 }
 0x311   : > { %p1663_p9 = pnand %p1669_p10, %p3589_p5 }
 0x313   : > { %2088 = dma.done.wait (!%p1663_p9), %s1340_s13, 2048  }
 0x314   : > { %2090 = vsyncadd (!%p1663_p9), %s1340_s13, 4294965248  ;;  %s21_s25 = sadd.s32 1, %s3586_s21   ;;  %s3590_s26 = sld [smem:[#allocation17_spill]] }
 0x315   : > { %p18_p11 = scmp.ge.s32.totalorder %s21_s25, 6   ;;  %s3591_s15 = smov %s2097_s16 }
 0x316   : > { %s3592_s16 = smov %s2101_s17  ;;  %s3593_s17 = smov %s2387_s18 }
 0x317   : > { %s3594_s18 = smov %s2109_s19  ;;  %s3595_s19 = smov %s2113_s20 }
 0x318   : > { %s3596_s20 = smov %s2382_s6  ;;  %s3597_s21 = smov %s2125_s23 }
 0x319   : > { %s3598_s22 = smov %s2129_s24  ;;  %s3600_s24 = smov %s3606_s1 }
 0x31a   : > { %s3599_s23 = smov %s3590_s26  ;;  %20 = sbr.rel (!%p18_p11) target bundleno = 14 (0xe), region = 101 }
 0x321   :  { %1345 = vsyncpa [#allocation3], 1 }
 0x322   :  { %1347 = vsyncpa [#allocation3 + $0x1], 1 }
 0x323   :  { %1348 = vsyncpa [#allocation6], 1 }
 0x324   :  { %1350 = vsyncpa [#allocation6 + $0x1], 1 }
 0x325   :  { %1351 = vsyncpa [#allocation4], 1 }
 0x326   :  { %1353 = vsyncpa [#allocation4 + $0x1], 1 }

</bundles_post_ra>
